<compile_context>
chip_gen: v7x
topology: tpu7x:2x2x1
jax: 0.10.0
libtpu: 0.0.40
codegen_flags: <defaults>
</compile_context>

<pallas_src>
import functools

import jax
import jax.numpy as jnp
from jax.experimental import pallas as pl
from jax.experimental.pallas import tpu as pltpu

D_MODEL = 512  # fixed by the module: Linear(512*2, 512) and Linear(512, 1)


def _round_up(x, m):
    return ((x + m - 1) // m) * m


def _pool_linear_kernel(enc_x_ref, enc_y_ref, inv_x_ref, inv_y_ref,
                        w1a_ref, w1b_ref, w2_ref, w_ref, ex_acc, ey_acc,
                        *, seq_len, seq_tile):
    s = pl.program_id(1)

    @pl.when(s == 0)
    def _init():
        ex_acc[...] = jnp.zeros_like(ex_acc)
        ey_acc[...] = jnp.zeros_like(ey_acc)

    # Steady state: cast+sum only (VPU/XLU) so the DMA pipeline of the big
    # activation tiles is never stalled by compute.  f32 accumulation keeps
    # bf16 inputs numerically equivalent to the f32 reference.
    xs = enc_x_ref[...].astype(jnp.float32)                 # (TB, TS, D)
    ys = enc_y_ref[...].astype(jnp.float32)

    if seq_len % seq_tile != 0:
        # The tail S tile is a partial block: rows >= seq_len hold undefined
        # data (activations are no longer padded in HBM), so mask them out.
        d = xs.shape[-1]
        row = jax.lax.broadcasted_iota(jnp.int32, (seq_tile, d), 0)
        valid = (row + s * seq_tile) < seq_len              # (TS, D) bool
        xs = jnp.where(valid[None], xs, 0.0)
        ys = jnp.where(valid[None], ys, 0.0)

    ex_acc[...] += jnp.sum(xs, axis=1)                      # (TB, D)
    ey_acc[...] += jnp.sum(ys, axis=1)                      # (TB, D)

    @pl.when(s == pl.num_programs(1) - 1)
    def _finalize():
        ex = ex_acc[...] * inv_x_ref[...]                   # (TB, D)
        ey = ey_acc[...] * inv_y_ref[...]                   # (TB, D)

        # linear1 (no bias) + ReLU, split contraction fed straight from the
        # two weight refs (no 2 MiB sliced temporary).
        h = (jnp.dot(ex, w1a_ref[...], preferred_element_type=jnp.float32) +
             jnp.dot(ey, w1b_ref[...], preferred_element_type=jnp.float32))
        h = jnp.maximum(h, 0.0)                             # (TB, D)

        # linear2 (no bias) + Sigmoid + clamp: VPU mul + lane reduce
        # (an N=1 matmul would waste an MXU push).
        logit = jnp.sum(h * w2_ref[...], axis=-1, keepdims=True)  # (TB, 1)
        w_ref[...] = jnp.clip(jax.nn.sigmoid(logit), 0.1, 0.9)


def _pick_tiles(B, S, x_bytes, y_bytes, b_tile, s_tile):
    """Generation-aware tile sizes + VMEM limit."""
    try:
        vmem_cap = pltpu.get_tpu_info().vmem_capacity_bytes
    except Exception:  # noqa: BLE001 - be conservative if the query fails
        vmem_cap = 64 * 1024 * 1024

    # Batch tile: full B for tiny batches, otherwise a multiple of 8 chosen so
    # there are >= 2 batch tiles (lets v7x's two TensorCores both stream HBM),
    # growing up to 32 for large B to amortize the MXU epilogue.
    if b_tile is not None:
        TB = B if B <= b_tile else b_tile
    elif B <= 8:
        TB = B
    else:
        TB = min(32, _round_up((B + 1) // 2, 8))

    if vmem_cap >= 100 * 1024 * 1024:        # v5e / v6e: 128 MiB VMEM per TC
        act_budget, vmem_limit = 80 << 20, 100 << 20
    else:                                    # v7x: 64 MiB VMEM per TC
        act_budget, vmem_limit = 32 << 20, 40 << 20

    if s_tile is None:
        # Budget covers: 2 inputs x 2 pipeline buffers + (pessimistically) one
        # unfused f32 copy of each tile during the cast+sum.
        per_row = TB * D_MODEL * (2 * (x_bytes + y_bytes) + 8)
        ts = min(1024, act_budget // per_row)
        ts = max(16, (ts // 16) * 16)        # bf16 sublane packing: mult of 16
        TS = S if S <= ts else ts
    else:
        TS = S if S <= s_tile else s_tile

    return TB, TS, vmem_limit


@functools.partial(jax.jit, static_argnames=("b_tile", "s_tile"))
def attention_params_forward(enc_x, x_attn, enc_y, y_attn, w1, w2,
                             *, b_tile=None, s_tile=None):
    """enc_x/enc_y: (B,S,512) encoder last_hidden_state (f32 or bf16);
    x_attn/y_attn: (B,S) attention masks (rows must have nonzero sums, as in
    the PyTorch reference); w1: (512, 1024) [torch Linear(1024,512).weight];
    w2: (1, 512) [torch Linear(512,1).weight]. Returns (B,) sample weights."""
    B, S, D = enc_x.shape
    assert D == D_MODEL
    assert enc_y.shape == (B, S, D)
    assert w1.shape == (D, 2 * D) and w2.shape == (1, D)

    f32 = jnp.float32
    # Mask-sum reciprocals computed once in the wrapper graph (tiny (B,1)) so
    # the kernel never touches the lane-sparse (B,S) masks.
    inv_x = 1.0 / jnp.sum(x_attn.astype(f32), axis=1, keepdims=True)   # (B,1)
    inv_y = 1.0 / jnp.sum(y_attn.astype(f32), axis=1, keepdims=True)   # (B,1)
    w1t = jnp.asarray(w1, f32).T                                       # (2D,D)
    w1a = w1t[:D]                                                      # (D, D)
    w1b = w1t[D:]                                                      # (D, D)
    w2 = jnp.asarray(w2, f32)                                          # (1, D)

    TB, TS, vmem_limit = _pick_tiles(B, S, enc_x.dtype.itemsize,
                                     enc_y.dtype.itemsize, b_tile, s_tile)
    # (8,128)/(16,128) tiling rules (explicit asserts per review).
    assert TB == B or TB % 8 == 0, ("bad batch tile", TB, B)
    assert TS == S or TS % 16 == 0, ("bad seq tile", TS, S)

    grid = (pl.cdiv(B, TB), pl.cdiv(S, TS))
    kernel = functools.partial(_pool_linear_kernel, seq_len=S, seq_tile=TS)

    w_col = pl.pallas_call(
        kernel,
        out_shape=jax.ShapeDtypeStruct((B, 1), f32),
        grid_spec=pltpu.PrefetchScalarGridSpec(
            num_scalar_prefetch=0,
            grid=grid,
            in_specs=[
                pl.BlockSpec((TB, TS, D), lambda b, s: (b, s, 0)),   # enc_x
                pl.BlockSpec((TB, TS, D), lambda b, s: (b, s, 0)),   # enc_y
                pl.BlockSpec((TB, 1), lambda b, s: (b, 0)),          # 1/sum(x_attn)
                pl.BlockSpec((TB, 1), lambda b, s: (b, 0)),          # 1/sum(y_attn)
                pl.BlockSpec((D, D), lambda b, s: (0, 0)),           # W1^T (ex half)
                pl.BlockSpec((D, D), lambda b, s: (0, 0)),           # W1^T (ey half)
                pl.BlockSpec((1, D), lambda b, s: (0, 0)),           # W2
            ],
            out_specs=pl.BlockSpec((TB, 1), lambda b, s: (b, 0)),
            scratch_shapes=[
                pltpu.VMEM((TB, D), f32),   # ex accumulator
                pltpu.VMEM((TB, D), f32),   # ey accumulator
            ],
        ),
        compiler_params=pltpu.CompilerParams(
            dimension_semantics=("parallel", "arbitrary"),
            vmem_limit_bytes=vmem_limit,
        ),
    )(enc_x, enc_y, inv_x, inv_y, w1a, w1b, w2)

    # torch.squeeze + batch-wide renormalization (tiny (B,) reduction).
    w = jnp.squeeze(w_col, axis=-1)                                    # (B,)
    return w * jnp.float32(B) / jnp.sum(w)


def _reference(enc_x, x_attn, enc_y, y_attn, w1, w2):
    f32 = jnp.float32
    ex = jnp.sum(enc_x.astype(f32), 1) / jnp.sum(x_attn.astype(f32), 1, keepdims=True)
    ey = jnp.sum(enc_y.astype(f32), 1) / jnp.sum(y_attn.astype(f32), 1, keepdims=True)
    h = jnp.maximum(jnp.concatenate([ex, ey], -1) @ w1.T, 0.0)
    w = jnp.clip(jax.nn.sigmoid(h @ w2.T), 0.1, 0.9)
    w = jnp.squeeze(w, -1)
    return w * enc_x.shape[0] / jnp.sum(w)


if __name__ == "__main__":
    D = D_MODEL
    root_key = jax.random.PRNGKey(0)

    def run_case(B, S, b_tile=None, s_tile=None, salt=0):
        ks = jax.random.split(jax.random.fold_in(root_key, salt), 6)
        # Synthetic encoder last_hidden_state tensors (stand-ins for the T5
        # encoders), fed as bf16 per the bandwidth recommendation.
        enc_x = jax.random.normal(ks[0], (B, S, D), jnp.float32).astype(jnp.bfloat16)
        enc_y = jax.random.normal(ks[1], (B, S, D), jnp.float32).astype(jnp.bfloat16)
        # 0/1 attention masks with guaranteed nonzero row sums.
        x_attn = (jax.random.uniform(ks[2], (B, S)) < 0.8).astype(jnp.float32)
        x_attn = x_attn.at[:, 0].set(1.0)
        y_attn = (jax.random.uniform(ks[3], (B, S)) < 0.8).astype(jnp.float32)
        y_attn = y_attn.at[:, 0].set(1.0)
        # Deterministic parameter init (torch Linear-style uniform bounds).
        bound1 = 1.0 / jnp.sqrt(2.0 * D)
        bound2 = 1.0 / jnp.sqrt(1.0 * D)
        w1 = jax.random.uniform(ks[4], (D, 2 * D), jnp.float32, -bound1, bound1)
        w2 = jax.random.uniform(ks[5], (1, D), jnp.float32, -bound2, bound2)

        out = attention_params_forward(enc_x, x_attn, enc_y, y_attn, w1, w2,
                                       b_tile=b_tile, s_tile=s_tile)
        out = jax.block_until_ready(out)
        ref = _reference(enc_x, x_attn, enc_y, y_attn, w1, w2)
        assert out.shape == (B,)
        assert jnp.allclose(out, ref, atol=1e-5, rtol=1e-5), (B, S, out, ref)

    # Small shapes consistent with the module (batch=2, seq=8, d_model=512).
    run_case(B=2, S=8)
    # Non-tile-aligned B and S: exercises the pad-free partial-block path
    # with the in-kernel sequence-tail mask and multiple batch tiles.
    run_case(B=10, S=40, b_tile=8, s_tile=16, salt=1)

    print("KERNEL_OK")
</pallas_src>

<mosaic_0001>
module attributes {stable_mosaic.version = 11 : i64} {
  func.func @_pool_linear_kernel(%arg0: i32, %arg1: i32, %arg2: memref<2x8x512xbf16, #tpu.memory_space<vmem>>, %arg3: memref<2x8x512xbf16, #tpu.memory_space<vmem>>, %arg4: memref<2x1xf32, #tpu.memory_space<vmem>>, %arg5: memref<2x1xf32, #tpu.memory_space<vmem>>, %arg6: memref<512x512xf32, #tpu.memory_space<vmem>>, %arg7: memref<512x512xf32, #tpu.memory_space<vmem>>, %arg8: memref<1x512xf32, #tpu.memory_space<vmem>>, %arg9: memref<2x1xf32, #tpu.memory_space<vmem>>, %arg10: memref<2x512xf32, #tpu.memory_space<vmem>>, %arg11: memref<2x512xf32, #tpu.memory_space<vmem>>) attributes {dimension_semantics = [#tpu.dimension_semantics<parallel>, #tpu.dimension_semantics<arbitrary>], iteration_bounds = array<i64: 1, 1>, scalar_prefetch = 0 : i64, scratch_operands = 2 : i64, tpu.core_type = #tpu.core_type<tc>, window_params = [{transform_indices = @transform_0, window_bounds = array<i64: 2, 8, 512>}, {transform_indices = @transform_1, window_bounds = array<i64: 2, 8, 512>}, {transform_indices = @transform_2, window_bounds = array<i64: 2, 1>}, {transform_indices = @transform_3, window_bounds = array<i64: 2, 1>}, {pipeline_mode = #tpu.pipeline_mode<synchronous>, transform_indices = @transform_4, window_bounds = array<i64: 512, 512>}, {pipeline_mode = #tpu.pipeline_mode<synchronous>, transform_indices = @transform_5, window_bounds = array<i64: 512, 512>}, {pipeline_mode = #tpu.pipeline_mode<synchronous>, transform_indices = @transform_6, window_bounds = array<i64: 1, 512>}, {transform_indices = @transform_7, window_bounds = array<i64: 2, 1>}]} {
    %c0_i32 = arith.constant 0 : i32
    %0 = arith.cmpi eq, %arg1, %c0_i32 : i32
    %1 = arith.extui %0 : i1 to i32
    %c0_i32_0 = arith.constant 0 : i32
    %2 = arith.cmpi ne, %1, %c0_i32_0 : i32
    scf.if %2 {
      %cst_17 = arith.constant 0.000000e+00 : f32
      %18 = vector.broadcast %cst_17 : f32 to vector<2x512xf32>
      %c0_18 = arith.constant 0 : index
      %c0_19 = arith.constant 0 : index
      %19 = vector.load %arg10[%c0_18, %c0_19] : memref<2x512xf32, #tpu.memory_space<vmem>>, vector<2x512xf32>
      tpu.vector_store %arg10[%c0_18, %c0_19], %18 {strides = array<i32>} : memref<2x512xf32, #tpu.memory_space<vmem>>, vector<2x512xf32>,
      %cst_20 = arith.constant 0.000000e+00 : f32
      %20 = vector.broadcast %cst_20 : f32 to vector<2x512xf32>
      %c0_21 = arith.constant 0 : index
      %c0_22 = arith.constant 0 : index
      %21 = vector.load %arg11[%c0_21, %c0_22] : memref<2x512xf32, #tpu.memory_space<vmem>>, vector<2x512xf32>
      tpu.vector_store %arg11[%c0_21, %c0_22], %20 {strides = array<i32>} : memref<2x512xf32, #tpu.memory_space<vmem>>, vector<2x512xf32>,
    } else {
    }
    %c0 = arith.constant 0 : index
    %c0_1 = arith.constant 0 : index
    %c0_2 = arith.constant 0 : index
    %3 = vector.load %arg2[%c0, %c0_1, %c0_2] : memref<2x8x512xbf16, #tpu.memory_space<vmem>>, vector<2x8x512xbf16>
    %4 = arith.extf %3 : vector<2x8x512xbf16> to vector<2x8x512xf32>
    %c0_3 = arith.constant 0 : index
    %c0_4 = arith.constant 0 : index
    %c0_5 = arith.constant 0 : index
    %5 = vector.load %arg3[%c0_3, %c0_4, %c0_5] : memref<2x8x512xbf16, #tpu.memory_space<vmem>>, vector<2x8x512xbf16>
    %6 = arith.extf %5 : vector<2x8x512xbf16> to vector<2x8x512xf32>
    %c0_6 = arith.constant 0 : index
    %c0_7 = arith.constant 0 : index
    %7 = vector.load %arg10[%c0_6, %c0_7] : memref<2x512xf32, #tpu.memory_space<vmem>>, vector<2x512xf32>
    %cst = arith.constant dense<0.000000e+00> : vector<2x512xf32>
    %8 = vector.multi_reduction <add>, %4, %cst [1] : vector<2x8x512xf32> to vector<2x512xf32>
    %9 = arith.addf %7, %8 : vector<2x512xf32>
    %c0_8 = arith.constant 0 : index
    %c0_9 = arith.constant 0 : index
    %10 = vector.load %arg10[%c0_8, %c0_9] : memref<2x512xf32, #tpu.memory_space<vmem>>, vector<2x512xf32>
    tpu.vector_store %arg10[%c0_8, %c0_9], %9 {strides = array<i32>} : memref<2x512xf32, #tpu.memory_space<vmem>>, vector<2x512xf32>,
    %c0_10 = arith.constant 0 : index
    %c0_11 = arith.constant 0 : index
    %11 = vector.load %arg11[%c0_10, %c0_11] : memref<2x512xf32, #tpu.memory_space<vmem>>, vector<2x512xf32>
    %cst_12 = arith.constant dense<0.000000e+00> : vector<2x512xf32>
    %12 = vector.multi_reduction <add>, %6, %cst_12 [1] : vector<2x8x512xf32> to vector<2x512xf32>
    %13 = arith.addf %11, %12 : vector<2x512xf32>
    %c0_13 = arith.constant 0 : index
    %c0_14 = arith.constant 0 : index
    %14 = vector.load %arg11[%c0_13, %c0_14] : memref<2x512xf32, #tpu.memory_space<vmem>>, vector<2x512xf32>
    tpu.vector_store %arg11[%c0_13, %c0_14], %13 {strides = array<i32>} : memref<2x512xf32, #tpu.memory_space<vmem>>, vector<2x512xf32>,
    %c0_i32_15 = arith.constant 0 : i32
    %15 = arith.cmpi eq, %arg1, %c0_i32_15 : i32
    %16 = arith.extui %15 : i1 to i32
    %c0_i32_16 = arith.constant 0 : i32
    %17 = arith.cmpi ne, %16, %c0_i32_16 : i32
    scf.if %17 {
      %c0_17 = arith.constant 0 : index
      %c0_18 = arith.constant 0 : index
      %18 = vector.load %arg10[%c0_17, %c0_18] : memref<2x512xf32, #tpu.memory_space<vmem>>, vector<2x512xf32>
      %c0_19 = arith.constant 0 : index
      %c0_20 = arith.constant 0 : index
      %19 = vector.load %arg4[%c0_19, %c0_20] : memref<2x1xf32, #tpu.memory_space<vmem>>, vector<2x1xf32>
      %20 = vector.broadcast %19 : vector<2x1xf32> to vector<2x512xf32>
      %21 = arith.mulf %18, %20 : vector<2x512xf32>
      %c0_21 = arith.constant 0 : index
      %c0_22 = arith.constant 0 : index
      %22 = vector.load %arg11[%c0_21, %c0_22] : memref<2x512xf32, #tpu.memory_space<vmem>>, vector<2x512xf32>
      %c0_23 = arith.constant 0 : index
      %c0_24 = arith.constant 0 : index
      %23 = vector.load %arg5[%c0_23, %c0_24] : memref<2x1xf32, #tpu.memory_space<vmem>>, vector<2x1xf32>
      %24 = vector.broadcast %23 : vector<2x1xf32> to vector<2x512xf32>
      %25 = arith.mulf %22, %24 : vector<2x512xf32>
      %c0_25 = arith.constant 0 : index
      %c0_26 = arith.constant 0 : index
      %26 = vector.load %arg6[%c0_25, %c0_26] : memref<512x512xf32, #tpu.memory_space<vmem>>, vector<512x512xf32>
      %cst_27 = arith.constant dense<0.000000e+00> : vector<2x512xf32>
      %27 = tpu.matmul %21, %26, %cst_27 {dimension_numbers = #tpu.dot_dimension_numbers<[1], [0], [0], [1], [0, 0, 1, 1], [], []>} : vector<2x512xf32>, vector<512x512xf32>, vector<2x512xf32> -> vector<2x512xf32>
      %c0_28 = arith.constant 0 : index
      %c0_29 = arith.constant 0 : index
      %28 = vector.load %arg7[%c0_28, %c0_29] : memref<512x512xf32, #tpu.memory_space<vmem>>, vector<512x512xf32>
      %cst_30 = arith.constant dense<0.000000e+00> : vector<2x512xf32>
      %29 = tpu.matmul %25, %28, %cst_30 {dimension_numbers = #tpu.dot_dimension_numbers<[1], [0], [0], [1], [0, 0, 1, 1], [], []>} : vector<2x512xf32>, vector<512x512xf32>, vector<2x512xf32> -> vector<2x512xf32>
      %30 = arith.addf %27, %29 : vector<2x512xf32>
      %cst_31 = arith.constant 0.000000e+00 : f32
      %31 = vector.broadcast %cst_31 : f32 to vector<2x512xf32>
      %32 = arith.maximumf %30, %31 : vector<2x512xf32>
      %c0_32 = arith.constant 0 : index
      %c0_33 = arith.constant 0 : index
      %33 = vector.load %arg8[%c0_32, %c0_33] : memref<1x512xf32, #tpu.memory_space<vmem>>, vector<1x512xf32>
      %34 = vector.broadcast %33 : vector<1x512xf32> to vector<2x512xf32>
      %35 = arith.mulf %32, %34 : vector<2x512xf32>
      %cst_34 = arith.constant dense<0.000000e+00> : vector<2xf32>
      %36 = vector.multi_reduction <add>, %35, %cst_34 [1] : vector<2x512xf32> to vector<2xf32>
      %37 = vector.shape_cast %36 : vector<2xf32> to vector<2x1xf32>
      %38 = arith.negf %37 : vector<2x1xf32>
      %39 = math.exp %38 : vector<2x1xf32>
      %cst_35 = arith.constant 1.000000e+00 : f32
      %40 = vector.broadcast %cst_35 : f32 to vector<2x1xf32>
      %41 = arith.addf %40, %39 : vector<2x1xf32>
      %42 = arith.divf %40, %41 : vector<2x1xf32>
      %cst_36 = arith.constant 1.000000e-01 : f32
      %cst_37 = arith.constant 0.899999976 : f32
      %43 = vector.broadcast %cst_36 : f32 to vector<2x1xf32>
      %44 = arith.maximumf %43, %42 : vector<2x1xf32>
      %45 = vector.broadcast %cst_37 : f32 to vector<2x1xf32>
      %46 = arith.minimumf %45, %44 : vector<2x1xf32>
      %c0_38 = arith.constant 0 : index
      %c0_39 = arith.constant 0 : index
      %47 = vector.load %arg9[%c0_38, %c0_39] : memref<2x1xf32, #tpu.memory_space<vmem>>, vector<2x1xf32>
      tpu.vector_store %arg9[%c0_38, %c0_39], %46 {strides = array<i32>} : memref<2x1xf32, #tpu.memory_space<vmem>>, vector<2x1xf32>,
    } else {
    }
    return
  }
  func.func @transform_0(%arg0: i32, %arg1: i32) -> (i32, i32, i32) {
    %c0_i32 = arith.constant 0 : i32
    %c0_i32_0 = arith.constant 0 : i32
    return %arg0, %arg1, %c0_i32 : i32, i32, i32
  }
  func.func @transform_1(%arg0: i32, %arg1: i32) -> (i32, i32, i32) {
    %c0_i32 = arith.constant 0 : i32
    %c0_i32_0 = arith.constant 0 : i32
    return %arg0, %arg1, %c0_i32 : i32, i32, i32
  }
  func.func @transform_2(%arg0: i32, %arg1: i32) -> (i32, i32) {
    %c0_i32 = arith.constant 0 : i32
    %c0_i32_0 = arith.constant 0 : i32
    return %arg0, %c0_i32 : i32, i32
  }
  func.func @transform_3(%arg0: i32, %arg1: i32) -> (i32, i32) {
    %c0_i32 = arith.constant 0 : i32
    %c0_i32_0 = arith.constant 0 : i32
    return %arg0, %c0_i32 : i32, i32
  }
  func.func @transform_4(%arg0: i32, %arg1: i32) -> (i32, i32) {
    %c0_i32 = arith.constant 0 : i32
    %c0_i32_0 = arith.constant 0 : i32
    %c0_i32_1 = arith.constant 0 : i32
    return %c0_i32, %c0_i32_0 : i32, i32
  }
  func.func @transform_5(%arg0: i32, %arg1: i32) -> (i32, i32) {
    %c0_i32 = arith.constant 0 : i32
    %c0_i32_0 = arith.constant 0 : i32
    %c0_i32_1 = arith.constant 0 : i32
    return %c0_i32, %c0_i32_0 : i32, i32
  }
  func.func @transform_6(%arg0: i32, %arg1: i32) -> (i32, i32) {
    %c0_i32 = arith.constant 0 : i32
    %c0_i32_0 = arith.constant 0 : i32
    %c0_i32_1 = arith.constant 0 : i32
    return %c0_i32, %c0_i32_0 : i32, i32
  }
  func.func @transform_7(%arg0: i32, %arg1: i32) -> (i32, i32) {
    %c0_i32 = arith.constant 0 : i32
    %c0_i32_0 = arith.constant 0 : i32
    return %arg0, %c0_i32 : i32, i32
  }
}

</mosaic_0001>

<bundles_post_ra>
// kernel: attention_params_forward.1
= control target key start
LH: loop header
LB: loop body
LE: loop exit
PB: predicated region body
PF: predicated region fallthrough
CT: control target
= control target key end

     0   :  { %v2008_v0 = vmov 0   ;;  %vm152_vm0 = vcmask 1041409   ;;  %vm154_vm1 = vcmask 1043459   ;;  %vm156_vm2 = vcmask 1045509   ;;  %s3680_s3 = inlined_call_operand.vmem [shape: f32[2,1], index: 3, kind: input, shape index: {}]   ;;  %s3681_s2 = inlined_call_operand.vmem [shape: f32[2,1], index: 2, kind: input, shape index: {}]   ;;  %s3682_s5 = inlined_call_operand.vmem [shape: f32[512,512], index: 5, kind: input, shape index: {}]   ;;  %s3683_s0 = inlined_call_operand.vmem [shape: bf16[2,8,512], index: 0, kind: input, shape index: {}]   ;;  %s3684_s1 = inlined_call_operand.vmem [shape: bf16[2,8,512], index: 1, kind: input, shape index: {}]   ;;  %s3685_s4 = inlined_call_operand.vmem [shape: f32[512,512], index: 4, kind: input, shape index: {}]   ;;  %s3686_s6 = inlined_call_operand.vmem [shape: f32[1,512], index: 6, kind: input, shape index: {}]   ;;  %s3687_s7 = inlined_call_operand.vmem [shape: f32[2,1], index: 7, kind: output, shape index: {}]  }
   0x1   :  { %2003 = vset.pattern.permute.xlu0 %v2008_v0  ;;  %v283_v1 = vld [vmem:[%s3680_s3] sm:$0x3]  ;;  %v554_v3 = vld [vmem:[%s3682_s5 + $0x8] sm:$0xff]  ;;  %v556_v5 = vld [vmem:[%s3682_s5 + $0x18] sm:$0xff]  ;;  %vm158_vm3 = vcmask 1047559   ;;  %vm1451_vm4 = vcmask 1041408  }
   0x2   :  { %v268_v2 = vld [vmem:[%s3681_s2] sm:$0x3]  ;;  %286 = vperm.xlu0 %2003, %v283_v1   ;;  %v558_v4 = vld [vmem:[%s3682_s5 + $0x28] sm:$0xff]  ;;  %v560_v6 = vld [vmem:[%s3682_s5 + $0x38] sm:$0xff]  ;;  %vm1469_vm5 = vcmask 1024  }
   0x3   :  { %v1476_v7 = vpack.c.bf16 %v558_v4, %v554_v3  ;;  %v1604_v8 = vpack.c.bf16 %v560_v6, %v556_v5  ;;  %v553_v9 = vld [vmem:[%s3682_s5] sm:$0xff]  ;;  %v555_v11 = vld [vmem:[%s3682_s5 + $0x10] sm:$0xff]  ;;  %v562_v14 = vld [vmem:[%s3682_s5 + $0x48] sm:$0xff] }
   0x4   :  { %v557_v10 = vld [vmem:[%s3682_s5 + $0x20] sm:$0xff]  ;;  %v559_v13 = vld [vmem:[%s3682_s5 + $0x30] sm:$0xff]  ;;  %v566_v15 = vld [vmem:[%s3682_s5 + $0x68] sm:$0xff] }
   0x5   :  { %v1478_v12 = vpack.c.bf16 %v557_v10, %v553_v9  ;;  %1477 = vmatprep.subr.bf16.mxu0 %v1476_v7  ;;  %1605 = vmatprep.subr.bf16.mxu1 %v1604_v8  ;;  %v1606_v16 = vpack.c.bf16 %v559_v13, %v555_v11  ;;  %v1480_v17 = vpack.c.bf16 %v566_v15, %v562_v14  ;;  %v564_v18 = vld [vmem:[%s3682_s5 + $0x58] sm:$0xff]  ;;  %v561_v20 = vld [vmem:[%s3682_s5 + $0x40] sm:$0xff]  ;;  %v563_v23 = vld [vmem:[%s3682_s5 + $0x50] sm:$0xff] }
   0x6   :  { %v568_v19 = vld [vmem:[%s3682_s5 + $0x78] sm:$0xff]  ;;  %271 = vperm.xlu0 %2003, %v268_v2   ;;  %v565_v22 = vld [vmem:[%s3682_s5 + $0x60] sm:$0xff]  ;;  %v567_v24 = vld [vmem:[%s3682_s5 + $0x70] sm:$0xff] }
   0x7   :  { %1479 = vmatpush1.bf16.msra.mxu0 %v1478_v12  ;;  %v1608_v21 = vpack.c.bf16 %v568_v19, %v564_v18  ;;  %1607 = vmatpush1.bf16.msra.mxu1 %v1606_v16  ;;  %v1482_v25 = vpack.c.bf16 %v565_v22, %v561_v20  ;;  %v1610_v26 = vpack.c.bf16 %v567_v24, %v563_v23  ;;  %v570_v27 = vld [vmem:[%s3682_s5 + $0x88] sm:$0xff]  ;;  %v572_v29 = vld [vmem:[%s3682_s5 + $0x98] sm:$0xff]  ;;  %v569_v32 = vld [vmem:[%s3682_s5 + $0x80] sm:$0xff] }
   0x8   :  { %1481 = vmatprep.subr.bf16.mxu0 %v1480_v17  ;;  %v574_v28 = vld [vmem:[%s3682_s5 + $0xa8] sm:$0xff]  ;;  %v576_v31 = vld [vmem:[%s3682_s5 + $0xb8] sm:$0xff]  ;;  %v573_v33 = vld [vmem:[%s3682_s5 + $0xa0] sm:$0xff] }
   0x9   :  { %1609 = vmatprep.subr.bf16.mxu1 %v1608_v21  ;;  %v1484_v30 = vpack.c.bf16 %v574_v28, %v570_v27  ;;  %v1612_v34 = vpack.c.bf16 %v576_v31, %v572_v29  ;;  %v571_v35 = vld [vmem:[%s3682_s5 + $0x90] sm:$0xff]  ;;  %v578_v37 = vld [vmem:[%s3682_s5 + $0xc8] sm:$0xff]  ;;  %v1486_v38 = vpack.c.bf16 %v573_v33, %v569_v32  ;;  %v580_v40 = vld [vmem:[%s3682_s5 + $0xd8] sm:$0xff] }
   0xa   :  { %v575_v36 = vld [vmem:[%s3682_s5 + $0xb0] sm:$0xff]  ;;  %v582_v39 = vld [vmem:[%s3682_s5 + $0xe8] sm:$0xff]  ;;  %v584_v41 = vld [vmem:[%s3682_s5 + $0xf8] sm:$0xff] }
   0xb   :  { %1483 = vmatpush1.bf16.msra.mxu0 %v1482_v25  ;;  %1611 = vmatpush1.bf16.msra.mxu1 %v1610_v26  ;;  %v1614_v42 = vpack.c.bf16 %v575_v36, %v571_v35  ;;  %v1488_v43 = vpack.c.bf16 %v582_v39, %v578_v37  ;;  %v577_v44 = vld [vmem:[%s3682_s5 + $0xc0] sm:$0xff]  ;;  %v579_v46 = vld [vmem:[%s3682_s5 + $0xd0] sm:$0xff]  ;;  %v1616_v47 = vpack.c.bf16 %v584_v41, %v580_v40  ;;  %v586_v49 = vld [vmem:[%s3682_s5 + $0x108] sm:$0xff] }
   0xc   :  { %1485 = vmatprep.subr.bf16.mxu0 %v1484_v30  ;;  %v581_v45 = vld [vmem:[%s3682_s5 + $0xe0] sm:$0xff]  ;;  %1613 = vmatprep.subr.bf16.mxu1 %v1612_v34  ;;  %v583_v48 = vld [vmem:[%s3682_s5 + $0xf0] sm:$0xff]  ;;  %v590_v50 = vld [vmem:[%s3682_s5 + $0x128] sm:$0xff] }
   0xd   :  { %v588_v51 = vld [vmem:[%s3682_s5 + $0x118] sm:$0xff]  ;;  %v1490_v53 = vpack.c.bf16 %v581_v45, %v577_v44  ;;  %v1618_v54 = vpack.c.bf16 %v583_v48, %v579_v46  ;;  %v1492_v55 = vpack.c.bf16 %v590_v50, %v586_v49  ;;  %v585_v56 = vld [vmem:[%s3682_s5 + $0x100] sm:$0xff]  ;;  %v587_v58 = vld [vmem:[%s3682_s5 + $0x110] sm:$0xff] }
   0xe   :  { %v592_v52 = vld [vmem:[%s3682_s5 + $0x138] sm:$0xff]  ;;  %v589_v57 = vld [vmem:[%s3682_s5 + $0x120] sm:$0xff]  ;;  %v591_v60 = vld [vmem:[%s3682_s5 + $0x130] sm:$0xff] }
   0xf   :  { %1487 = vmatpush1.bf16.msra.mxu0 %v1486_v38  ;;  %1615 = vmatpush1.bf16.msra.mxu1 %v1614_v42  ;;  %v1620_v59 = vpack.c.bf16 %v592_v52, %v588_v51  ;;  %v594_v61 = vld [vmem:[%s3682_s5 + $0x148] sm:$0xff]  ;;  %v596_v63 = vld [vmem:[%s3682_s5 + $0x158] sm:$0xff]  ;;  %v1494_v1 = vpack.c.bf16 %v589_v57, %v585_v56  ;;  %v1622_v2 = vpack.c.bf16 %v591_v60, %v587_v58  ;;  %v593_v4 = vld [vmem:[%s3682_s5 + $0x140] sm:$0xff] }
  0x10   :  { %1489 = vmatprep.subr.bf16.mxu0 %v1488_v43  ;;  %1617 = vmatprep.subr.bf16.mxu1 %v1616_v47  ;;  %v598_v62 = vld [vmem:[%s3682_s5 + $0x168] sm:$0xff]  ;;  %v600_v0 = vld [vmem:[%s3682_s5 + $0x178] sm:$0xff]  ;;  %v597_v5 = vld [vmem:[%s3682_s5 + $0x160] sm:$0xff] }
  0x11   :  { %v1496_v3 = vpack.c.bf16 %v598_v62, %v594_v61  ;;  %v595_v6 = vld [vmem:[%s3682_s5 + $0x150] sm:$0xff]  ;;  %v1624_v7 = vpack.c.bf16 %v600_v0, %v596_v63  ;;  %v602_v9 = vld [vmem:[%s3682_s5 + $0x188] sm:$0xff]  ;;  %v604_v11 = vld [vmem:[%s3682_s5 + $0x198] sm:$0xff]  ;;  %v1498_v13 = vpack.c.bf16 %v597_v5, %v593_v4 }
  0x12   :  { %v599_v8 = vld [vmem:[%s3682_s5 + $0x170] sm:$0xff]  ;;  %v606_v10 = vld [vmem:[%s3682_s5 + $0x1a8] sm:$0xff]  ;;  %v608_v12 = vld [vmem:[%s3682_s5 + $0x1b8] sm:$0xff] }
  0x13   :  { %1491 = vmatpush1.bf16.msra.mxu0 %v1490_v53  ;;  %1619 = vmatpush1.bf16.msra.mxu1 %v1618_v54  ;;  %v1626_v14 = vpack.c.bf16 %v599_v8, %v595_v6  ;;  %v1500_v15 = vpack.c.bf16 %v606_v10, %v602_v9  ;;  %v601_v16 = vld [vmem:[%s3682_s5 + $0x180] sm:$0xff]  ;;  %v603_v18 = vld [vmem:[%s3682_s5 + $0x190] sm:$0xff]  ;;  %v1628_v19 = vpack.c.bf16 %v608_v12, %v604_v11  ;;  %v610_v21 = vld [vmem:[%s3682_s5 + $0x1c8] sm:$0xff] }
  0x14   :  { %1493 = vmatprep.subr.bf16.mxu0 %v1492_v55  ;;  %1621 = vmatprep.subr.bf16.mxu1 %v1620_v59  ;;  %v605_v17 = vld [vmem:[%s3682_s5 + $0x1a0] sm:$0xff]  ;;  %v607_v20 = vld [vmem:[%s3682_s5 + $0x1b0] sm:$0xff]  ;;  %v614_v22 = vld [vmem:[%s3682_s5 + $0x1e8] sm:$0xff] }
  0x15   :  { %v612_v23 = vld [vmem:[%s3682_s5 + $0x1d8] sm:$0xff]  ;;  %v1502_v25 = vpack.c.bf16 %v605_v17, %v601_v16  ;;  %v1630_v26 = vpack.c.bf16 %v607_v20, %v603_v18  ;;  %v1504_v27 = vpack.c.bf16 %v614_v22, %v610_v21  ;;  %v609_v28 = vld [vmem:[%s3682_s5 + $0x1c0] sm:$0xff]  ;;  %v611_v30 = vld [vmem:[%s3682_s5 + $0x1d0] sm:$0xff] }
  0x16   :  { %v616_v24 = vld [vmem:[%s3682_s5 + $0x1f8] sm:$0xff]  ;;  %v613_v29 = vld [vmem:[%s3682_s5 + $0x1e0] sm:$0xff]  ;;  %v615_v32 = vld [vmem:[%s3682_s5 + $0x1f0] sm:$0xff] }
  0x17   :  { %1495 = vmatpush1.bf16.msra.mxu0 %v1494_v1  ;;  %1623 = vmatpush1.bf16.msra.mxu1 %v1622_v2  ;;  %v1632_v31 = vpack.c.bf16 %v616_v24, %v612_v23  ;;  %v618_v33 = vld [vmem:[%s3682_s5 + $0x208] sm:$0xff]  ;;  %v620_v35 = vld [vmem:[%s3682_s5 + $0x218] sm:$0xff]  ;;  %v1506_v37 = vpack.c.bf16 %v613_v29, %v609_v28  ;;  %v1634_v38 = vpack.c.bf16 %v615_v32, %v611_v30  ;;  %v617_v40 = vld [vmem:[%s3682_s5 + $0x200] sm:$0xff] }
  0x18   :  { %1497 = vmatprep.subr.bf16.mxu0 %v1496_v3  ;;  %1625 = vmatprep.subr.bf16.mxu1 %v1624_v7  ;;  %v622_v34 = vld [vmem:[%s3682_s5 + $0x228] sm:$0xff]  ;;  %v624_v36 = vld [vmem:[%s3682_s5 + $0x238] sm:$0xff]  ;;  %v621_v41 = vld [vmem:[%s3682_s5 + $0x220] sm:$0xff] }
  0x19   :  { %v1508_v39 = vpack.c.bf16 %v622_v34, %v618_v33  ;;  %v619_v42 = vld [vmem:[%s3682_s5 + $0x210] sm:$0xff]  ;;  %v1636_v43 = vpack.c.bf16 %v624_v36, %v620_v35  ;;  %v626_v45 = vld [vmem:[%s3682_s5 + $0x248] sm:$0xff]  ;;  %v628_v47 = vld [vmem:[%s3682_s5 + $0x258] sm:$0xff]  ;;  %v1510_v49 = vpack.c.bf16 %v621_v41, %v617_v40 }
  0x1a   :  { %v623_v44 = vld [vmem:[%s3682_s5 + $0x230] sm:$0xff]  ;;  %v630_v46 = vld [vmem:[%s3682_s5 + $0x268] sm:$0xff]  ;;  %v632_v48 = vld [vmem:[%s3682_s5 + $0x278] sm:$0xff] }
  0x1b   :  { %1499 = vmatpush1.bf16.msra.mxu0 %v1498_v13  ;;  %1627 = vmatpush1.bf16.msra.mxu1 %v1626_v14  ;;  %v1638_v50 = vpack.c.bf16 %v623_v44, %v619_v42  ;;  %v1512_v51 = vpack.c.bf16 %v630_v46, %v626_v45  ;;  %v625_v52 = vld [vmem:[%s3682_s5 + $0x240] sm:$0xff]  ;;  %v627_v54 = vld [vmem:[%s3682_s5 + $0x250] sm:$0xff]  ;;  %v1640_v55 = vpack.c.bf16 %v632_v48, %v628_v47  ;;  %v634_v57 = vld [vmem:[%s3682_s5 + $0x288] sm:$0xff] }
  0x1c   :  { %1501 = vmatprep.subr.bf16.mxu0 %v1500_v15  ;;  %1629 = vmatprep.subr.bf16.mxu1 %v1628_v19  ;;  %v629_v53 = vld [vmem:[%s3682_s5 + $0x260] sm:$0xff]  ;;  %v631_v56 = vld [vmem:[%s3682_s5 + $0x270] sm:$0xff]  ;;  %v638_v58 = vld [vmem:[%s3682_s5 + $0x2a8] sm:$0xff] }
  0x1d   :  { %v636_v59 = vld [vmem:[%s3682_s5 + $0x298] sm:$0xff]  ;;  %v1514_v61 = vpack.c.bf16 %v629_v53, %v625_v52  ;;  %v1642_v62 = vpack.c.bf16 %v631_v56, %v627_v54  ;;  %v1516_v63 = vpack.c.bf16 %v638_v58, %v634_v57  ;;  %v633_v0 = vld [vmem:[%s3682_s5 + $0x280] sm:$0xff]  ;;  %v635_v2 = vld [vmem:[%s3682_s5 + $0x290] sm:$0xff] }
  0x1e   :  { %v640_v60 = vld [vmem:[%s3682_s5 + $0x2b8] sm:$0xff]  ;;  %v637_v1 = vld [vmem:[%s3682_s5 + $0x2a0] sm:$0xff]  ;;  %v639_v4 = vld [vmem:[%s3682_s5 + $0x2b0] sm:$0xff] }
  0x1f   :  { %1503 = vmatpush1.bf16.msra.mxu0 %v1502_v25  ;;  %1631 = vmatpush1.bf16.msra.mxu1 %v1630_v26  ;;  %v1644_v3 = vpack.c.bf16 %v640_v60, %v636_v59  ;;  %v642_v5 = vld [vmem:[%s3682_s5 + $0x2c8] sm:$0xff]  ;;  %v644_v7 = vld [vmem:[%s3682_s5 + $0x2d8] sm:$0xff]  ;;  %v1518_v9 = vpack.c.bf16 %v637_v1, %v633_v0  ;;  %v1646_v10 = vpack.c.bf16 %v639_v4, %v635_v2  ;;  %v641_v12 = vld [vmem:[%s3682_s5 + $0x2c0] sm:$0xff] }
  0x20   :  { %1505 = vmatprep.subr.bf16.mxu0 %v1504_v27  ;;  %1633 = vmatprep.subr.bf16.mxu1 %v1632_v31  ;;  %v646_v6 = vld [vmem:[%s3682_s5 + $0x2e8] sm:$0xff]  ;;  %v648_v8 = vld [vmem:[%s3682_s5 + $0x2f8] sm:$0xff]  ;;  %v645_v13 = vld [vmem:[%s3682_s5 + $0x2e0] sm:$0xff] }
  0x21   :  { %v1520_v11 = vpack.c.bf16 %v646_v6, %v642_v5  ;;  %v643_v14 = vld [vmem:[%s3682_s5 + $0x2d0] sm:$0xff]  ;;  %v1648_v15 = vpack.c.bf16 %v648_v8, %v644_v7  ;;  %v650_v17 = vld [vmem:[%s3682_s5 + $0x308] sm:$0xff]  ;;  %v652_v19 = vld [vmem:[%s3682_s5 + $0x318] sm:$0xff]  ;;  %v1522_v21 = vpack.c.bf16 %v645_v13, %v641_v12 }
  0x22   :  { %v647_v16 = vld [vmem:[%s3682_s5 + $0x2f0] sm:$0xff]  ;;  %v654_v18 = vld [vmem:[%s3682_s5 + $0x328] sm:$0xff]  ;;  %v656_v20 = vld [vmem:[%s3682_s5 + $0x338] sm:$0xff] }
  0x23   :  { %1507 = vmatpush1.bf16.msra.mxu0 %v1506_v37  ;;  %1635 = vmatpush1.bf16.msra.mxu1 %v1634_v38  ;;  %v1650_v22 = vpack.c.bf16 %v647_v16, %v643_v14  ;;  %v1524_v23 = vpack.c.bf16 %v654_v18, %v650_v17  ;;  %v649_v24 = vld [vmem:[%s3682_s5 + $0x300] sm:$0xff]  ;;  %v651_v26 = vld [vmem:[%s3682_s5 + $0x310] sm:$0xff]  ;;  %v1652_v27 = vpack.c.bf16 %v656_v20, %v652_v19  ;;  %v658_v29 = vld [vmem:[%s3682_s5 + $0x348] sm:$0xff] }
  0x24   :  { %1509 = vmatprep.subr.bf16.mxu0 %v1508_v39  ;;  %1637 = vmatprep.subr.bf16.mxu1 %v1636_v43  ;;  %v653_v25 = vld [vmem:[%s3682_s5 + $0x320] sm:$0xff]  ;;  %v655_v28 = vld [vmem:[%s3682_s5 + $0x330] sm:$0xff]  ;;  %v662_v30 = vld [vmem:[%s3682_s5 + $0x368] sm:$0xff] }
  0x25   :  { %v660_v31 = vld [vmem:[%s3682_s5 + $0x358] sm:$0xff]  ;;  %v1526_v33 = vpack.c.bf16 %v653_v25, %v649_v24  ;;  %v657_v34 = vld [vmem:[%s3682_s5 + $0x340] sm:$0xff]  ;;  %v1654_v35 = vpack.c.bf16 %v655_v28, %v651_v26  ;;  %v1528_v36 = vpack.c.bf16 %v662_v30, %v658_v29  ;;  %v659_v38 = vld [vmem:[%s3682_s5 + $0x350] sm:$0xff] }
  0x26   :  { %v664_v32 = vld [vmem:[%s3682_s5 + $0x378] sm:$0xff]  ;;  %v661_v37 = vld [vmem:[%s3682_s5 + $0x360] sm:$0xff]  ;;  %v663_v39 = vld [vmem:[%s3682_s5 + $0x370] sm:$0xff] }
  0x27   :  { %1511 = vmatpush1.bf16.msra.mxu0 %v1510_v49  ;;  %1639 = vmatpush1.bf16.msra.mxu1 %v1638_v50  ;;  %v1656_v40 = vpack.c.bf16 %v664_v32, %v660_v31  ;;  %v666_v41 = vld [vmem:[%s3682_s5 + $0x388] sm:$0xff]  ;;  %v32_v43 = vld [vmem:[%s3683_s0] sm:$0xff]  ;;  %v668_v44 = vld [vmem:[%s3682_s5 + $0x398] sm:$0xff]  ;;  %v1530_v46 = vpack.c.bf16 %v661_v37, %v657_v34  ;;  %v1658_v49 = vpack.c.bf16 %v663_v39, %v659_v38  ;;  %v2009_v39 = vmov 1983009808  }
  0x28   :  { %1513 = vmatprep.subr.bf16.mxu0 %v1512_v51  ;;  %1641 = vmatprep.subr.bf16.mxu1 %v1640_v55  ;;  %v670_v42 = vld [vmem:[%s3682_s5 + $0x3a8] sm:$0xff]  ;;  %v672_v45 = vld [vmem:[%s3682_s5 + $0x3b8] sm:$0xff]  ;;  %v665_v47 = vld [vmem:[%s3682_s5 + $0x380] sm:$0xff]  ;;  %v36_v54 = vunpack.c.l.bf16 %v32_v43  ;;  %v37_v58 = vunpack.c.h.bf16 %v32_v43 }
  0x29   :  { %v33_v48 = vld [vmem:[%s3683_s0 + $0x8] sm:$0xff]  ;;  %v1532_v50 = vpack.c.bf16 %v670_v42, %v666_v41  ;;  %v669_v51 = vld [vmem:[%s3682_s5 + $0x3a0] sm:$0xff]  ;;  %v34_v52 = vld [vmem:[%s3683_s0 + $0x10] sm:$0xff]  ;;  %v1660_v55 = vpack.c.bf16 %v672_v45, %v668_v44  ;;  %v118_v41 = vlaneseq }
  0x2a   :  { %v2423_v53 = vld [vmem:[%s3683_s0 + $0x18] sm:$0xff]  ;;  %v667_v56 = vld [vmem:[%s3682_s5 + $0x390] sm:$0xff]  ;;  %v38_v59 = vunpack.c.l.bf16 %v33_v48  ;;  %v39_v60 = vunpack.c.h.bf16 %v33_v48  ;;  %v57_v2 = vrot.slane %v36_v54, 4  ;;  %v674_v32 = vld [vmem:[%s3682_s5 + $0x3c8] sm:$0xff] }
  0x2b   :  { %1515 = vmatpush1.bf16.msra.mxu0 %v1514_v61  ;;  %1643 = vmatpush1.bf16.msra.mxu1 %v1642_v62  ;;  %v671_v57 = vld [vmem:[%s3682_s5 + $0x3b0] sm:$0xff]  ;;  %v1534_v61 = vpack.c.bf16 %v669_v51, %v665_v47  ;;  %v40_v62 = vunpack.c.l.bf16 %v34_v52  ;;  %v42_v0 = vunpack.c.l.bf16 %v2423_v53  ;;  %v43_v18 = vunpack.c.h.bf16 %v2423_v53  ;;  %v678_v37 = vld [vmem:[%s3682_s5 + $0x3e8] sm:$0xff]  ;;  %v676_v38 = vld [vmem:[%s3682_s5 + $0x3d8] sm:$0xff] }
  0x2c   :  { %1517 = vmatprep.subr.bf16.mxu0 %v1516_v63  ;;  %1645 = vmatprep.subr.bf16.mxu1 %v1644_v3  ;;  %v41_v63 = vunpack.c.h.bf16 %v34_v52  ;;  %v1662_v1 = vpack.c.bf16 %v671_v57, %v667_v56  ;;  %v63_v3 = vrot.slane %v37_v58, 4  ;;  %v69_v4 = vrot.slane %v38_v59, 4  ;;  %v680_v44 = vld [vmem:[%s3682_s5 + $0x3f8] sm:$0xff]  ;;  %v673_v45 = vld [vmem:[%s3682_s5 + $0x3c0] sm:$0xff]  ;;  %v675_v51 = vld [vmem:[%s3682_s5 + $0x3d0] sm:$0xff] }
  0x2d   :  { %v75_v5 = vrot.slane %v39_v60, 4  ;;  %v81_v6 = vrot.slane %v40_v62, 4  ;;  %v58_v8 = vadd.f32 %v57_v2, %v36_v54  ;;  %v679_v52 = vld [vmem:[%s3682_s5 + $0x3f0] sm:$0xff]  ;;  %v1536_v57 = vpack.c.bf16 %v678_v37, %v674_v32  ;;  %v688_v2 = vld [vmem:[%s3682_s5 + $0x438] sm:$0xff] }
  0x2e   :  { %v87_v7 = vrot.slane %v41_v63, 4  ;;  %v46_v53 = vld [vmem:[%s3684_s1 + $0x10] sm:$0xff] }
  0x2f   :  { %1519 = vmatpush1.bf16.msra.mxu0 %v1518_v9  ;;  %1647 = vmatpush1.bf16.msra.mxu1 %v1646_v10  ;;  %v64_v9 = vadd.f32 %v63_v3, %v37_v58  ;;  %v93_v10 = vrot.slane %v42_v0, 4  ;;  %v76_v12 = vadd.f32 %v75_v5, %v39_v60  ;;  %v82_v13 = vadd.f32 %v81_v6, %v40_v62  ;;  %v682_v58 = vld [vmem:[%s3682_s5 + $0x408] sm:$0xff]  ;;  %v47_v60 = vld [vmem:[%s3684_s1 + $0x18] sm:$0xff]  ;;  %v44_v6 = vld [vmem:[%s3684_s1] sm:$0xff] }
  0x30   :  { %1521 = vmatprep.subr.bf16.mxu0 %v1520_v11  ;;  %1649 = vmatprep.subr.bf16.mxu1 %v1648_v15  ;;  %v70_v11 = vadd.f32 %v69_v4, %v38_v59  ;;  %v88_v14 = vadd.f32 %v87_v7, %v41_v63  ;;  %v59_v15 = vrot.slane %v58_v8, 2  ;;  %v686_v59 = vld [vmem:[%s3682_s5 + $0x428] sm:$0xff]  ;;  %v1664_v63 = vpack.c.bf16 %v680_v44, %v676_v38 }
  0x31   :  { %v65_v16 = vrot.slane %v64_v9, 2  ;;  %v94_v17 = vadd.f32 %v93_v10, %v42_v0  ;;  %v77_v20 = vrot.slane %v76_v12, 2  ;;  %v2475_v4 = vshrl.u32 %v118_v41, 7 }
  0x32   :  { %v71_v19 = vrot.slane %v70_v11, 2  ;;  %v89_v24 = vrot.slane %v88_v14, 2  ;;  %v1666_v5 = vpack.c.bf16 %v679_v52, %v675_v51  ;;  %v52_v7 = vunpack.c.l.bf16 %v46_v53 }
  0x33   :  { %1523 = vmatpush1.bf16.msra.mxu0 %v1522_v21  ;;  %1651 = vmatpush1.bf16.msra.mxu1 %v1650_v22  ;;  %v83_v21 = vrot.slane %v82_v13, 2  ;;  %v60_v22 = vadd.f32 %v59_v15, %v58_v8  ;;  %v78_v26 = vadd.f32 %v77_v20, %v76_v12  ;;  %v95_v31 = vrot.slane %v94_v17, 2 }
  0x34   :  { %1525 = vmatprep.subr.bf16.mxu0 %v1524_v23  ;;  %1653 = vmatprep.subr.bf16.mxu1 %v1652_v27  ;;  %v66_v23 = vadd.f32 %v65_v16, %v64_v9  ;;  %v72_v25 = vadd.f32 %v71_v19, %v70_v11  ;;  %v90_v30 = vadd.f32 %v89_v24, %v88_v14  ;;  %v53_v8 = vunpack.c.h.bf16 %v46_v53  ;;  %v45_v11 = vld [vmem:[%s3684_s1 + $0x8] sm:$0xff] }
  0x35   :  { %v84_v27 = vadd.f32 %v83_v21, %v82_v13  ;;  %v61_v28 = vrot.slane %v60_v22, 1  ;;  %v79_v34 = vrot.slane %v78_v26, 1  ;;  %v96_v43 = vadd.f32 %v95_v31, %v94_v17 }
  0x36   :  { %v67_v29 = vrot.slane %v66_v23, 1  ;;  %v91_v42 = vrot.slane %v90_v30, 1  ;;  %v1540_v10 = vpack.c.bf16 %v686_v59, %v682_v58  ;;  %v54_v12 = vunpack.c.l.bf16 %v47_v60 }
  0x37   :  { %1527 = vmatpush1.bf16.msra.mxu0 %v1526_v33  ;;  %1655 = vmatpush1.bf16.msra.mxu1 %v1654_v35  ;;  %v73_v33 = vrot.slane %v72_v25, 1  ;;  %v85_v35 = vrot.slane %v84_v27, 1  ;;  %v62_v47 = vadd.f32 %v61_v28, %v60_v22  ;;  %v80_v54 = vadd.f32 %v79_v34, %v78_v26 }
  0x38   :  { %1529 = vmatprep.subr.bf16.mxu0 %v1528_v36  ;;  %1657 = vmatprep.subr.bf16.mxu1 %v1656_v40  ;;  %v99_v36 = vrot.slane %v43_v18, 4  ;;  %v116_v40 = vunpack.c.l.s4 %v2009_v39  ;;  %v68_v48 = vadd.f32 %v67_v29, %v66_v23  ;;  %v92_v56 = vadd.f32 %v91_v42, %v90_v30 }
  0x39   :  { %v55_v13 = vunpack.c.h.bf16 %v47_v60  ;;  %v48_v21 = vunpack.c.l.bf16 %v44_v6  ;;  %v49_v22 = vunpack.c.h.bf16 %v44_v6  ;;  %v50_v23 = vunpack.c.l.bf16 %v45_v11 }
  0x3a   :  { %v117_v3 = vunpack.c.0.s8 %v116_v40  ;;  %v113_v14 = vcombine.low %v62_v47, %v68_v48  ;;  %v51_v24 = vunpack.c.h.bf16 %v45_v11  ;;  %v188_v26 = vrot.slane %v52_v7, 4 }
  0x3b   :  { %1531 = vmatpush1.bf16.msra.mxu0 %v1530_v46  ;;  %1659 = vmatpush1.bf16.msra.mxu1 %v1658_v49  ;;  %v677_v46 = vld [vmem:[%s3682_s5 + $0x3e0] sm:$0xff]  ;;  %v74_v49 = vadd.f32 %v73_v33, %v72_v25  ;;  %v200_v28 = vrot.slane %v54_v12, 4  ;;  %v206_v29 = vrot.slane %v55_v13, 4  ;;  %v164_v34 = vrot.slane %v48_v21, 4 }
  0x3c   :  { %1533 = vmatprep.subr.bf16.mxu0 %v1532_v50  ;;  %1661 = vmatprep.subr.bf16.mxu1 %v1660_v55  ;;  %v100_v50 = vadd.f32 %v99_v36, %v43_v18  ;;  %v86_v55 = vadd.f32 %v85_v35, %v84_v27  ;;  %v1538_v0 = vpack.c.bf16 %v677_v46, %v673_v45  ;;  %v194_v27 = vrot.slane %v53_v8, 4 }
  0x3d   :  { %v114_v18 = vcombine.low %v74_v49, %v80_v54  ;;  %v2484_v20 = vsub.s32 %v117_v3, %v2475_v4  ;;  %v170_v35 = vrot.slane %v49_v22, 4  ;;  %v176_v37 = vrot.slane %v50_v23, 4 }
  0x3e   :  { %v101_v62 = vrot.slane %v100_v50, 2  ;;  %v130_v19 = vcombine.low %v86_v55, %v92_v56  ;;  %v182_v38 = vrot.slane %v51_v24, 4  ;;  %v189_v39 = vadd.f32 %v188_v26, %v52_v7 }
  0x3f   :  { %1535 = vmatpush1.bf16.msra.mxu0 %v1534_v61  ;;  %1663 = vmatpush1.bf16.msra.mxu1 %v1662_v1  ;;  %v97_v61 = vrot.slane %v96_v43, 1  ;;  %v684_v1 = vld [vmem:[%s3682_s5 + $0x418] sm:$0xff]  ;;  %v121_v30 = vrot.slane %v113_v14, %v2484_v20  ;;  %v128_v31 = vrot.slane %v114_v18, %v2484_v20  ;;  %v195_v40 = vadd.f32 %v194_v27, %v53_v8 }
  0x40   :  { %1537 = vmatprep.subr.bf16.mxu0 %v1536_v57  ;;  %v102_v9 = vadd.f32 %v101_v62, %v100_v50  ;;  %1665 = vmatprep.subr.bf16.mxu1 %v1664_v63  ;;  %v1668_v15 = vpack.c.bf16 %v688_v2, %v684_v1  ;;  %v138_v33 = vrot.slane %v130_v19, %v2484_v20  ;;  %v190_v50 = vrot.slane %v189_v39, 2 }
  0x41   :  { %v98_v16 = vadd.f32 %v97_v61, %v96_v43  ;;  %v201_v41 = vadd.f32 %v200_v28, %v54_v12  ;;  %v207_v42 = vadd.f32 %v206_v29, %v55_v13  ;;  %v129_v43 = vcombine.low %v121_v30, %v128_v31 }
  0x42   :  { %v103_v17 = vrot.slane %v102_v9, 1  ;;  %v165_v45 = vadd.f32 %v164_v34, %v48_v21  ;;  %v171_v47 = vadd.f32 %v170_v35, %v49_v22  ;;  %v177_v48 = vadd.f32 %v176_v37, %v50_v23 }
  0x43   :  { %1539 = vmatpush1.bf16.msra.mxu0 %v1538_v0  ;;  %1667 = vmatpush1.bf16.msra.mxu1 %v1666_v5  ;;  %v183_v49 = vadd.f32 %v182_v38, %v51_v24  ;;  %v196_v51 = vrot.slane %v195_v40, 2  ;;  %v202_v52 = vrot.slane %v201_v41, 2  ;;  %v208_v53 = vrot.slane %v207_v42, 2 }
  0x44   :  { %1541 = vmatprep.subr.bf16.mxu0 %v1540_v10  ;;  %1669 = vmatprep.subr.bf16.mxu1 %v1668_v15  ;;  %v104_v25 = vadd.f32 %v103_v17, %v102_v9  ;;  %v166_v56 = vrot.slane %v165_v45, 2  ;;  %v172_v58 = vrot.slane %v171_v47, 2  ;;  %v178_v59 = vrot.slane %v177_v48, 2 }
  0x45   :  { %v184_v60 = vrot.slane %v183_v49, 2  ;;  %v191_v62 = vadd.f32 %v190_v50, %v189_v39  ;;  %v197_v63 = vadd.f32 %v196_v51, %v195_v40  ;;  %v203_v0 = vadd.f32 %v202_v52, %v201_v41  ;;  %v687_v50 = vld [vmem:[%s3682_s5 + $0x430] sm:$0xff] }
  0x46   :  { %v131_v32 = vcombine.low %v98_v16, %v104_v25  ;;  %v209_v1 = vadd.f32 %v208_v53, %v207_v42  ;;  %v167_v2 = vadd.f32 %v166_v56, %v165_v45  ;;  %v173_v3 = vadd.f32 %v172_v58, %v171_v47  ;;  %v685_v47 = vld [vmem:[%s3682_s5 + $0x420] sm:$0xff]  ;;  %v694_v56 = vld [vmem:[%s3682_s5 + $0x468] sm:$0xff]  ;;  %v696_v58 = vld [vmem:[%s3682_s5 + $0x478] sm:$0xff] }
  0x47   :  { %v179_v5 = vadd.f32 %v178_v59, %v177_v48  ;;  %v185_v6 = vadd.f32 %v184_v60, %v183_v49  ;;  %v192_v7 = vrot.slane %v191_v62, 1  ;;  %v198_v8 = vrot.slane %v197_v63, 1  ;;  %v683_v49 = vld [vmem:[%s3682_s5 + $0x410] sm:$0xff] }
  0x48   :  { %v145_v36 = vrot.slane %v131_v32, %v2484_v20  ;;  %v204_v9 = vrot.slane %v203_v0, 1  ;;  %v210_v10 = vrot.slane %v209_v1, 1  ;;  %v168_v11 = vrot.slane %v167_v2, 1 }
  0x49   :  { %v174_v12 = vrot.slane %v173_v3, 1  ;;  %v180_v13 = vrot.slane %v179_v5, 1  ;;  %v186_v14 = vrot.slane %v185_v6, 1  ;;  %v193_v15 = vadd.f32 %v192_v7, %v191_v62 }
  0x4a   :  { %v146_v44 = vcombine.low %v138_v33, %v145_v36  ;;  %v199_v16 = vadd.f32 %v198_v8, %v197_v63  ;;  %v205_v17 = vadd.f32 %v204_v9, %v203_v0  ;;  %v211_v18 = vadd.f32 %v210_v10, %v209_v1  ;;  %v689_v0 = vld [vmem:[%s3682_s5 + $0x440] sm:$0xff]  ;;  %v702_v8 = vld [vmem:[%s3682_s5 + $0x4a8] sm:$0xff]  ;;  %v700_v9 = vld [vmem:[%s3682_s5 + $0x498] sm:$0xff] }
  0x4b   :  { %v169_v19 = vadd.f32 %v168_v11, %v167_v2  ;;  %v175_v21 = vadd.f32 %v174_v12, %v173_v3  ;;  %v181_v22 = vadd.f32 %v180_v13, %v179_v5  ;;  %v187_v23 = vadd.f32 %v186_v14, %v185_v6  ;;  %v693_v1 = vld [vmem:[%s3682_s5 + $0x460] sm:$0xff]  ;;  %v691_v2 = vld [vmem:[%s3682_s5 + $0x450] sm:$0xff]  ;;  %v704_v10 = vld [vmem:[%s3682_s5 + $0x4b8] sm:$0xff] }
  0x4c   :  { %v151_v46 = vrot.slane %v146_v44, 7  ;;  %v237_v24 = vcombine.low %v193_v15, %v199_v16  ;;  %v238_v25 = vcombine.low %v205_v17, %v211_v18  ;;  %v2010_v35 = vmov 269488144   ;;  %v695_v3 = vld [vmem:[%s3682_s5 + $0x470] sm:$0xff]  ;;  %v697_v13 = vld [vmem:[%s3682_s5 + $0x480] sm:$0xff] }
  0x4d   :  { %v220_v26 = vcombine.low %v169_v19, %v175_v21  ;;  %v221_v27 = vcombine.low %v181_v22, %v187_v23  ;;  %v274_v36 = vunpack.c.l.s4 %v2010_v35  ;;  %v1670_v63 = vpack.c.bf16 %v687_v50, %v683_v49  ;;  %v701_v14 = vld [vmem:[%s3682_s5 + $0x4a0] sm:$0xff]  ;;  %v699_v17 = vld [vmem:[%s3682_s5 + $0x490] sm:$0xff]  ;;  %v706_v19 = vld [vmem:[%s3682_s5 + $0x4c8] sm:$0xff] }
  0x4e   :  { %v153_v54 = vsel %vm152_vm0, %v151_v46, %v129_v43  ;;  %v245_v28 = vrot.slane %v237_v24, %v2484_v20  ;;  %v252_v29 = vrot.slane %v238_v25, %v2484_v20  ;;  %v1546_v11 = vpack.c.bf16 %v693_v1, %v689_v0  ;;  %v703_v18 = vld [vmem:[%s3682_s5 + $0x4b0] sm:$0xff]  ;;  %v710_v21 = vld [vmem:[%s3682_s5 + $0x4e8] sm:$0xff]  ;;  %v708_v22 = vld [vmem:[%s3682_s5 + $0x4d8] sm:$0xff] }
  0x4f   :  { %v155_v55 = vsel %vm154_vm1, %v151_v46, %v153_v54  ;;  %v228_v30 = vrot.slane %v220_v26, %v2484_v20  ;;  %v235_v31 = vrot.slane %v221_v27, %v2484_v20  ;;  %v275_v38 = vunpack.c.0.s8 %v274_v36  ;;  %v690_v54 = vld [vmem:[%s3682_s5 + $0x448] sm:$0xff]  ;;  %v712_v23 = vld [vmem:[%s3682_s5 + $0x4f8] sm:$0xff]  ;;  %v705_v26 = vld [vmem:[%s3682_s5 + $0x4c0] sm:$0xff] }
  0x50   :  { %v157_v57 = vsel %vm156_vm2, %v151_v46, %v155_v55  ;;  %v253_v32 = vcombine.low %v245_v28, %v252_v29  ;;  %v1544_v6 = vpack.c.bf16 %v694_v56, %v690_v54  ;;  %v1674_v12 = vpack.c.bf16 %v695_v3, %v691_v2  ;;  %v709_v27 = vld [vmem:[%s3682_s5 + $0x4e0] sm:$0xff]  ;;  %v720_v35 = vld [vmem:[%s3682_s5 + $0x538] sm:$0xff]  ;;  %v723_v54 = vld [vmem:[%s3682_s5 + $0x550] sm:$0xff] }
  0x51   :  { %v159_v61 = vsel %vm158_vm3, %v151_v46, %v157_v57  ;;  %v236_v33 = vcombine.low %v228_v30, %v235_v31  ;;  %v278_v40 = vsub.s32 %v275_v38, %v2475_v4  ;;  %v681_v46 = vld [vmem:[%s3682_s5 + $0x400] sm:$0xff]  ;;  %v692_v57 = vld [vmem:[%s3682_s5 + $0x458] sm:$0xff]  ;;  %v1676_v16 = vpack.c.bf16 %v704_v10, %v700_v9  ;;  %v707_v30 = vld [vmem:[%s3682_s5 + $0x4d0] sm:$0xff] }
  0x52   :  { %v256_v34 = vrot.slane %v253_v32, 7  ;;  %v1542_v55 = vpack.c.bf16 %v685_v47, %v681_v46  ;;  %v1672_v7 = vpack.c.bf16 %v696_v58, %v692_v57  ;;  %v1550_v24 = vpack.c.bf16 %v701_v14, %v697_v13  ;;  %v711_v31 = vld [vmem:[%s3682_s5 + $0x4f0] sm:$0xff]  ;;  %v714_v32 = vld [vmem:[%s3682_s5 + $0x508] sm:$0xff]  ;;  %v713_v38 = vld [vmem:[%s3682_s5 + $0x500] sm:$0xff] }
  0x53   :  { %v1678_v25 = vpack.c.bf16 %v703_v18, %v699_v17  ;;  %v1552_v28 = vpack.c.bf16 %v710_v21, %v706_v19  ;;  %v1680_v29 = vpack.c.bf16 %v712_v23, %v708_v22  ;;  %v1554_v36 = vpack.c.bf16 %v709_v27, %v705_v26  ;;  %v724_v46 = vld [vmem:[%s3682_s5 + $0x558] sm:$0xff]  ;;  %v721_v50 = vld [vmem:[%s3682_s5 + $0x540] sm:$0xff]  ;;  %v730_v56 = vld [vmem:[%s3682_s5 + $0x588] sm:$0xff] }
  0x54   :  { %v257_v37 = vsel %vm152_vm0, %v256_v34, %v236_v33  ;;  %v718_v33 = vld [vmem:[%s3682_s5 + $0x528] sm:$0xff]  ;;  %v728_v47 = vld [vmem:[%s3682_s5 + $0x578] sm:$0xff]  ;;  %v729_v1 = vld [vmem:[%s3682_s5 + $0x580] sm:$0xff] }
  0x55   :  { %v258_v39 = vsel %vm154_vm1, %v256_v34, %v257_v37  ;;  %v1682_v37 = vpack.c.bf16 %v711_v31, %v707_v30  ;;  %v734_v57 = vld [vmem:[%s3682_s5 + $0x5a8] sm:$0xff]  ;;  %v732_v58 = vld [vmem:[%s3682_s5 + $0x598] sm:$0xff]  ;;  %v733_v2 = vld [vmem:[%s3682_s5 + $0x5a0] sm:$0xff] }
  0x56   :  { %v259_v41 = vsel %vm156_vm2, %v256_v34, %v258_v39  ;;  %v717_v39 = vld [vmem:[%s3682_s5 + $0x520] sm:$0xff]  ;;  %v1564_v3 = vpack.c.bf16 %v734_v57, %v730_v56  ;;  %v740_v9 = vld [vmem:[%s3682_s5 + $0x5d8] sm:$0xff]  ;;  %v739_v17 = vld [vmem:[%s3682_s5 + $0x5d0] sm:$0xff] }
  0x57   :  { %v260_v43 = vsel %vm158_vm3, %v256_v34, %v259_v41  ;;  %v716_v34 = vld [vmem:[%s3682_s5 + $0x518] sm:$0xff]  ;;  %v737_v13 = vld [vmem:[%s3682_s5 + $0x5c0] sm:$0xff]  ;;  %v743_v18 = vld [vmem:[%s3682_s5 + $0x5f0] sm:$0xff] }
  0x58   :  { %v1684_v41 = vpack.c.bf16 %v720_v35, %v716_v34  ;;  %v744_v10 = vld [vmem:[%s3682_s5 + $0x5f8] sm:$0xff]  ;;  %v741_v14 = vld [vmem:[%s3682_s5 + $0x5e0] sm:$0xff]  ;;  %v746_v19 = vld [vmem:[%s3682_s5 + $0x608] sm:$0xff] }
  0x59   :  { %v750_v21 = vld [vmem:[%s3682_s5 + $0x628] sm:$0xff]  ;;  %v748_v22 = vld [vmem:[%s3682_s5 + $0x618] sm:$0xff]  ;;  %v745_v26 = vld [vmem:[%s3682_s5 + $0x600] sm:$0xff] }
  0x5a   :  { %v752_v23 = vld [vmem:[%s3682_s5 + $0x638] sm:$0xff]  ;;  %v749_v27 = vld [vmem:[%s3682_s5 + $0x620] sm:$0xff]  ;;  %v747_v30 = vld [vmem:[%s3682_s5 + $0x610] sm:$0xff] }
  0x5b   :  { %v751_v31 = vld [vmem:[%s3682_s5 + $0x630] sm:$0xff]  ;;  %v756_v34 = vld [vmem:[%s3682_s5 + $0x658] sm:$0xff]  ;;  %v770_v56 = vld [vmem:[%s3682_s5 + $0x6c8] sm:$0xff] }
  0x5c   :  { %v760_v35 = vld [vmem:[%s3682_s5 + $0x678] sm:$0xff]  ;;  %v774_v57 = vld [vmem:[%s3682_s5 + $0x6e8] sm:$0xff] }
  0x81   :  { %v287_v42 = vpop.permute.xlu0 %286 }
  0x82   :  { %v294_v44 = vrot.slane %v287_v42, %v278_v40  ;;  %v715_v42 = vld [vmem:[%s3682_s5 + $0x510] sm:$0xff] }
  0x84   :  { %v296_v45 = vmul.f32 %v294_v44, %v260_v43  ;;  %v719_v43 = vld [vmem:[%s3682_s5 + $0x530] sm:$0xff]  ;;  %v722_v44 = vld [vmem:[%s3682_s5 + $0x548] sm:$0xff] }
  0x85   :  { %v272_v48 = vpop.permute.xlu0 %271  ;;  %v1686_v49 = vpack.c.bf16 %v719_v43, %v715_v42  ;;  %v755_v42 = vld [vmem:[%s3682_s5 + $0x650] sm:$0xff] }
  0x86   :  { %v810_v51 = vcombine.high %v296_v45, %v296_v45  ;;  %v817_v52 = vrot.slane %v296_v45, %v2484_v20  ;;  %v279_v53 = vrot.slane %v272_v48, %v278_v40  ;;  %v1556_v40 = vpack.c.bf16 %v718_v33, %v714_v32  ;;  %v726_v45 = vld [vmem:[%s3682_s5 + $0x568] sm:$0xff]  ;;  %v759_v43 = vld [vmem:[%s3682_s5 + $0x670] sm:$0xff] }
  0x87   :  { %v1558_v48 = vpack.c.bf16 %v717_v39, %v713_v38  ;;  %v754_v32 = vld [vmem:[%s3682_s5 + $0x648] sm:$0xff]  ;;  %v753_v38 = vld [vmem:[%s3682_s5 + $0x640] sm:$0xff] }
  0x88   :  { %v2529_v59 = vrot.slane %v810_v51, %v2484_v20  ;;  %v2531_v60 = vmul.f32 %v279_v53, %v159_v61  ;;  %v825_v62 = vcombine.high %v817_v52, %v817_v52  ;;  %v698_v61 = vld [vmem:[%s3682_s5 + $0x488] sm:$0xff]  ;;  %v725_v51 = vld [vmem:[%s3682_s5 + $0x560] sm:$0xff]  ;;  %v1688_v53 = vpack.c.bf16 %v728_v47, %v724_v46  ;;  %v764_v46 = vld [vmem:[%s3682_s5 + $0x698] sm:$0xff] }
  0x89   :  { %v1548_v15 = vpack.c.bf16 %v702_v8, %v698_v61  ;;  %v742_v8 = vld [vmem:[%s3682_s5 + $0x5e8] sm:$0xff]  ;;  %v757_v39 = vld [vmem:[%s3682_s5 + $0x660] sm:$0xff]  ;;  %v768_v47 = vld [vmem:[%s3682_s5 + $0x6b8] sm:$0xff] }
  0x8a   :  { %895 = vmatprep.mubr.f32.mxu0 %v825_v62  ;;  %1037 = vmatprep.mubr.f32.mxu1 %v825_v62  ;;  %v826_v5 = vcombine.high %v2529_v59, %v2529_v59  ;;  %v736_v62 = vld [vmem:[%s3682_s5 + $0x5b8] sm:$0xff]  ;;  %v758_v33 = vld [vmem:[%s3682_s5 + $0x668] sm:$0xff] }
  0x8b   :  { %896 = vmatmul.mubr.f32.vlgmr.msra.gmra.mrb[0].mxu0 %v817_v52  ;;  %1038 = vmatmul.mubr.f32.vlgmr.msra.gmra.mrb[0].mxu1 %v817_v52  ;;  %v1560_v52 = vpack.c.bf16 %v726_v45, %v722_v44  ;;  %v1692_v61 = vpack.c.bf16 %v736_v62, %v732_v58  ;;  %v762_v44 = vld [vmem:[%s3682_s5 + $0x688] sm:$0xff]  ;;  %v772_v58 = vld [vmem:[%s3682_s5 + $0x6d8] sm:$0xff] }
  0x8c   :  { %1543 = vmatpush1.bf16.msra.mxu0 %v1542_v55  ;;  %1671 = vmatpush1.bf16.msra.mxu1 %v1670_v63  ;;  %v727_v55 = vld [vmem:[%s3682_s5 + $0x570] sm:$0xff]  ;;  %v1562_v63 = vpack.c.bf16 %v725_v51, %v721_v50  ;;  %v766_v45 = vld [vmem:[%s3682_s5 + $0x6a8] sm:$0xff]  ;;  %v761_v50 = vld [vmem:[%s3682_s5 + $0x680] sm:$0xff] }
  0x8d   :  { %966 = vmatprep.mubr.f32.mxu0 %v826_v5  ;;  %1108 = vmatprep.mubr.f32.mxu1 %v826_v5  ;;  %v1690_v0 = vpack.c.bf16 %v727_v55, %v723_v54  ;;  %v731_v5 = vld [vmem:[%s3682_s5 + $0x590] sm:$0xff]  ;;  %v765_v51 = vld [vmem:[%s3682_s5 + $0x6a0] sm:$0xff]  ;;  %v776_v62 = vld [vmem:[%s3682_s5 + $0x6f8] sm:$0xff] }
  0x8e   :  { %1545 = vmatprep.subr.bf16.mxu0 %v1544_v6  ;;  %1673 = vmatprep.subr.bf16.mxu1 %v1672_v7  ;;  %v735_v6 = vld [vmem:[%s3682_s5 + $0x5b0] sm:$0xff]  ;;  %v738_v7 = vld [vmem:[%s3682_s5 + $0x5c8] sm:$0xff] }
  0x8f   :  { %v763_v54 = vld [vmem:[%s3682_s5 + $0x690] sm:$0xff] }
  0x90   :  { %1547 = vmatpush1.bf16.msra.mxu0 %v1546_v11  ;;  %1675 = vmatpush1.bf16.msra.mxu1 %v1674_v12  ;;  %v1566_v11 = vpack.c.bf16 %v733_v2, %v729_v1  ;;  %v1694_v12 = vpack.c.bf16 %v735_v6, %v731_v5  ;;  %v767_v55 = vld [vmem:[%s3682_s5 + $0x6b0] sm:$0xff]  ;;  %v769_v1 = vld [vmem:[%s3682_s5 + $0x6c0] sm:$0xff] }
  0x91   :  { %1549 = vmatprep.subr.bf16.mxu0 %v1548_v15  ;;  %1677 = vmatprep.subr.bf16.mxu1 %v1676_v16  ;;  %v1568_v15 = vpack.c.bf16 %v742_v8, %v738_v7  ;;  %v1696_v16 = vpack.c.bf16 %v744_v10, %v740_v9  ;;  %v773_v2 = vld [vmem:[%s3682_s5 + $0x6e0] sm:$0xff]  ;;  %v771_v5 = vld [vmem:[%s3682_s5 + $0x6d0] sm:$0xff]  ;;  %v778_v7 = vld [vmem:[%s3682_s5 + $0x708] sm:$0xff] }
  0x92   :  { %v775_v6 = vld [vmem:[%s3682_s5 + $0x6f0] sm:$0xff]  ;;  %v782_v8 = vld [vmem:[%s3682_s5 + $0x728] sm:$0xff]  ;;  %v780_v9 = vld [vmem:[%s3682_s5 + $0x718] sm:$0xff] }
  0x93   :  { %v784_v10 = vld [vmem:[%s3682_s5 + $0x738] sm:$0xff] }
  0x94   :  { %1551 = vmatpush1.bf16.msra.mxu0 %v1550_v24  ;;  %1679 = vmatpush1.bf16.msra.mxu1 %v1678_v25  ;;  %v1570_v24 = vpack.c.bf16 %v741_v14, %v737_v13  ;;  %v1698_v25 = vpack.c.bf16 %v743_v18, %v739_v17  ;;  %v777_v13 = vld [vmem:[%s3682_s5 + $0x700] sm:$0xff]  ;;  %v779_v17 = vld [vmem:[%s3682_s5 + $0x710] sm:$0xff] }
  0x95   :  { %1553 = vmatprep.subr.bf16.mxu0 %v1552_v28  ;;  %1681 = vmatprep.subr.bf16.mxu1 %v1680_v29  ;;  %v1572_v28 = vpack.c.bf16 %v750_v21, %v746_v19  ;;  %v1700_v29 = vpack.c.bf16 %v752_v23, %v748_v22  ;;  %v781_v14 = vld [vmem:[%s3682_s5 + $0x720] sm:$0xff]  ;;  %v783_v18 = vld [vmem:[%s3682_s5 + $0x730] sm:$0xff]  ;;  %v786_v19 = vld [vmem:[%s3682_s5 + $0x748] sm:$0xff] }
  0x96   :  { %v790_v21 = vld [vmem:[%s3682_s5 + $0x768] sm:$0xff]  ;;  %v788_v22 = vld [vmem:[%s3682_s5 + $0x758] sm:$0xff] }
  0x97   :  { %v792_v23 = vld [vmem:[%s3682_s5 + $0x778] sm:$0xff] }
  0x98   :  { %1555 = vmatpush1.bf16.msra.mxu0 %v1554_v36  ;;  %1683 = vmatpush1.bf16.msra.mxu1 %v1682_v37  ;;  %v1574_v36 = vpack.c.bf16 %v749_v27, %v745_v26  ;;  %v1702_v37 = vpack.c.bf16 %v751_v31, %v747_v30  ;;  %v785_v26 = vld [vmem:[%s3682_s5 + $0x740] sm:$0xff]  ;;  %v787_v30 = vld [vmem:[%s3682_s5 + $0x750] sm:$0xff] }
  0x99   :  { %1557 = vmatprep.subr.bf16.mxu0 %v1556_v40  ;;  %1685 = vmatprep.subr.bf16.mxu1 %v1684_v41  ;;  %v1576_v40 = vpack.c.bf16 %v758_v33, %v754_v32  ;;  %v1704_v41 = vpack.c.bf16 %v760_v35, %v756_v34  ;;  %v789_v27 = vld [vmem:[%s3682_s5 + $0x760] sm:$0xff]  ;;  %v791_v31 = vld [vmem:[%s3682_s5 + $0x770] sm:$0xff]  ;;  %v794_v32 = vld [vmem:[%s3682_s5 + $0x788] sm:$0xff] }
  0x9a   :  { %v798_v33 = vld [vmem:[%s3682_s5 + $0x7a8] sm:$0xff]  ;;  %v796_v34 = vld [vmem:[%s3682_s5 + $0x798] sm:$0xff] }
  0x9b   :  { %v800_v35 = vld [vmem:[%s3682_s5 + $0x7b8] sm:$0xff] }
  0x9c   :  { %1559 = vmatpush1.bf16.msra.mxu0 %v1558_v48  ;;  %1687 = vmatpush1.bf16.msra.mxu1 %v1686_v49  ;;  %v1578_v48 = vpack.c.bf16 %v757_v39, %v753_v38  ;;  %v1706_v49 = vpack.c.bf16 %v759_v43, %v755_v42  ;;  %v793_v38 = vld [vmem:[%s3682_s5 + $0x780] sm:$0xff]  ;;  %v795_v42 = vld [vmem:[%s3682_s5 + $0x790] sm:$0xff] }
  0x9d   :  { %1561 = vmatprep.subr.bf16.mxu0 %v1560_v52  ;;  %1689 = vmatprep.subr.bf16.mxu1 %v1688_v53  ;;  %v1580_v52 = vpack.c.bf16 %v766_v45, %v762_v44  ;;  %v1708_v53 = vpack.c.bf16 %v768_v47, %v764_v46  ;;  %v797_v39 = vld [vmem:[%s3682_s5 + $0x7a0] sm:$0xff]  ;;  %v799_v43 = vld [vmem:[%s3682_s5 + $0x7b0] sm:$0xff]  ;;  %v802_v44 = vld [vmem:[%s3682_s5 + $0x7c8] sm:$0xff] }
  0x9e   :  { %v806_v45 = vld [vmem:[%s3682_s5 + $0x7e8] sm:$0xff]  ;;  %v804_v46 = vld [vmem:[%s3682_s5 + $0x7d8] sm:$0xff] }
  0x9f   :  { %v808_v47 = vld [vmem:[%s3682_s5 + $0x7f8] sm:$0xff] }
  0xa0   :  { %1563 = vmatpush1.bf16.msra.mxu0 %v1562_v63  ;;  %1691 = vmatpush1.bf16.msra.mxu1 %v1690_v0  ;;  %v1582_v63 = vpack.c.bf16 %v765_v51, %v761_v50  ;;  %v1710_v0 = vpack.c.bf16 %v767_v55, %v763_v54  ;;  %v801_v50 = vld [vmem:[%s3682_s5 + $0x7c0] sm:$0xff]  ;;  %v803_v54 = vld [vmem:[%s3682_s5 + $0x7d0] sm:$0xff] }
  0xa1   :  { %1565 = vmatprep.subr.bf16.mxu0 %v1564_v3  ;;  %1693 = vmatprep.subr.bf16.mxu1 %v1692_v61  ;;  %v1584_v3 = vpack.c.bf16 %v774_v57, %v770_v56  ;;  %v1712_v61 = vpack.c.bf16 %v776_v62, %v772_v58  ;;  %v805_v51 = vld [vmem:[%s3682_s5 + $0x7e0] sm:$0xff]  ;;  %v807_v55 = vld [vmem:[%s3682_s5 + $0x7f0] sm:$0xff]  ;;  %v298_v56 = vld [vmem:[%s3685_s4 + $0x8] sm:$0xff] }
  0xa2   :  { %v302_v57 = vld [vmem:[%s3685_s4 + $0x28] sm:$0xff]  ;;  %v300_v58 = vld [vmem:[%s3685_s4 + $0x18] sm:$0xff] }
  0xa3   :  { %v304_v62 = vld [vmem:[%s3685_s4 + $0x38] sm:$0xff] }
  0xa4   :  { %1567 = vmatpush1.bf16.msra.mxu0 %v1566_v11  ;;  %1695 = vmatpush1.bf16.msra.mxu1 %v1694_v12  ;;  %v1586_v11 = vpack.c.bf16 %v773_v2, %v769_v1  ;;  %v1714_v12 = vpack.c.bf16 %v775_v6, %v771_v5  ;;  %v1732_v1 = vpack.c.bf16 %v302_v57, %v298_v56  ;;  %v299_v6 = vld [vmem:[%s3685_s4 + $0x10] sm:$0xff]  ;;  %v338_v57 = vld [vmem:[%s3685_s4 + $0x148] sm:$0xff] }
  0xa5   :  { %1569 = vmatprep.subr.bf16.mxu0 %v1568_v15  ;;  %1697 = vmatprep.subr.bf16.mxu1 %v1696_v16  ;;  %v1588_v15 = vpack.c.bf16 %v782_v8, %v778_v7  ;;  %v1716_v16 = vpack.c.bf16 %v784_v10, %v780_v9  ;;  %v1860_v2 = vpack.c.bf16 %v304_v62, %v300_v58  ;;  %v303_v7 = vld [vmem:[%s3685_s4 + $0x30] sm:$0xff]  ;;  %v306_v8 = vld [vmem:[%s3685_s4 + $0x48] sm:$0xff]  ;;  %v308_v10 = vld [vmem:[%s3685_s4 + $0x58] sm:$0xff] }
  0xa6   :  { %v2903_v5 = vrot.slane %v2531_v60, %v2484_v20  ;;  %v310_v9 = vld [vmem:[%s3685_s4 + $0x68] sm:$0xff]  ;;  %v335_v56 = vld [vmem:[%s3685_s4 + $0x130] sm:$0xff]  ;;  %v340_v62 = vld [vmem:[%s3685_s4 + $0x158] sm:$0xff] }
  0xa7   :  { %v342_v58 = vld [vmem:[%s3685_s4 + $0x168] sm:$0xff] }
  0xa8   :  { %1571 = vmatpush1.bf16.msra.mxu0 %v1570_v24  ;;  %1699 = vmatpush1.bf16.msra.mxu1 %v1698_v25  ;;  %v1590_v24 = vpack.c.bf16 %v781_v14, %v777_v13  ;;  %v1718_v25 = vpack.c.bf16 %v783_v18, %v779_v17  ;;  %v1862_v13 = vpack.c.bf16 %v303_v7, %v299_v6  ;;  %v305_v14 = vld [vmem:[%s3685_s4 + $0x40] sm:$0xff]  ;;  %v339_v6 = vld [vmem:[%s3685_s4 + $0x150] sm:$0xff] }
  0xa9   :  { %1573 = vmatprep.subr.bf16.mxu0 %v1572_v28  ;;  %1701 = vmatprep.subr.bf16.mxu1 %v1700_v29  ;;  %v1592_v28 = vpack.c.bf16 %v790_v21, %v786_v19  ;;  %v1720_v29 = vpack.c.bf16 %v792_v23, %v788_v22  ;;  %v1131_v17 = vcombine.high %v2903_v5, %v2903_v5  ;;  %v311_v21 = vld [vmem:[%s3685_s4 + $0x70] sm:$0xff]  ;;  %v314_v22 = vld [vmem:[%s3685_s4 + $0x88] sm:$0xff] }
  0xaa   :  { %v1736_v18 = vpack.c.bf16 %v310_v9, %v306_v8  ;;  %v318_v23 = vld [vmem:[%s3685_s4 + $0xa8] sm:$0xff]  ;;  %v343_v8 = vld [vmem:[%s3685_s4 + $0x170] sm:$0xff] }
  0xab   :  { %v346_v9 = vld [vmem:[%s3685_s4 + $0x188] sm:$0xff] }
  0xac   :  { %1575 = vmatpush1.bf16.msra.mxu0 %v1574_v36  ;;  %1703 = vmatpush1.bf16.msra.mxu1 %v1702_v37  ;;  %v1594_v36 = vpack.c.bf16 %v789_v27, %v785_v26  ;;  %v1722_v37 = vpack.c.bf16 %v791_v31, %v787_v30  ;;  %v315_v30 = vld [vmem:[%s3685_s4 + $0x90] sm:$0xff] }
  0xad   :  { %1577 = vmatprep.subr.bf16.mxu0 %v1576_v40  ;;  %1705 = vmatprep.subr.bf16.mxu1 %v1704_v41  ;;  %v1596_v40 = vpack.c.bf16 %v798_v33, %v794_v32  ;;  %v1724_v41 = vpack.c.bf16 %v800_v35, %v796_v34  ;;  %v319_v32 = vld [vmem:[%s3685_s4 + $0xb0] sm:$0xff]  ;;  %v322_v33 = vld [vmem:[%s3685_s4 + $0xc8] sm:$0xff]  ;;  %v324_v35 = vld [vmem:[%s3685_s4 + $0xd8] sm:$0xff] }
  0xae   :  { %v326_v34 = vld [vmem:[%s3685_s4 + $0xe8] sm:$0xff] }
  0xb0   :  { %1579 = vmatpush1.bf16.msra.mxu0 %v1578_v48  ;;  %1707 = vmatpush1.bf16.msra.mxu1 %v1706_v49  ;;  %v1598_v48 = vpack.c.bf16 %v797_v39, %v793_v38  ;;  %v1726_v49 = vpack.c.bf16 %v799_v43, %v795_v42  ;;  %v1870_v38 = vpack.c.bf16 %v319_v32, %v315_v30  ;;  %v323_v42 = vld [vmem:[%s3685_s4 + $0xd0] sm:$0xff] }
  0xb1   :  { %1581 = vmatprep.subr.bf16.mxu0 %v1580_v52  ;;  %1709 = vmatprep.subr.bf16.mxu1 %v1708_v53  ;;  %v1600_v52 = vpack.c.bf16 %v806_v45, %v802_v44  ;;  %v1728_v53 = vpack.c.bf16 %v808_v47, %v804_v46  ;;  %v1744_v39 = vpack.c.bf16 %v326_v34, %v322_v33  ;;  %v327_v44 = vld [vmem:[%s3685_s4 + $0xf0] sm:$0xff]  ;;  %v330_v45 = vld [vmem:[%s3685_s4 + $0x108] sm:$0xff]  ;;  %v332_v47 = vld [vmem:[%s3685_s4 + $0x118] sm:$0xff] }
  0xb2   :  { %v334_v46 = vld [vmem:[%s3685_s4 + $0x128] sm:$0xff]  ;;  %v355_v30 = vld [vmem:[%s3685_s4 + $0x1d0] sm:$0xff] }
  0xb3   :  { %v359_v32 = vld [vmem:[%s3685_s4 + $0x1f0] sm:$0xff]  ;;  %v362_v33 = vld [vmem:[%s3685_s4 + $0x208] sm:$0xff] }
  0xb4   :  { %1583 = vmatpush1.bf16.msra.mxu0 %v1582_v63  ;;  %1711 = vmatpush1.bf16.msra.mxu1 %v1710_v0  ;;  %v1602_v63 = vpack.c.bf16 %v805_v51, %v801_v50  ;;  %v1730_v0 = vpack.c.bf16 %v807_v55, %v803_v54  ;;  %v1874_v50 = vpack.c.bf16 %v327_v44, %v323_v42  ;;  %v331_v54 = vld [vmem:[%s3685_s4 + $0x110] sm:$0xff]  ;;  %v366_v34 = vld [vmem:[%s3685_s4 + $0x228] sm:$0xff] }
  0xb5   :  { %1585 = vmatprep.subr.bf16.mxu0 %v1584_v3  ;;  %1713 = vmatprep.subr.bf16.mxu1 %v1712_v61  ;;  %v297_v3 = vld [vmem:[%s3685_s4] sm:$0xff]  ;;  %v1748_v51 = vpack.c.bf16 %v334_v46, %v330_v45  ;;  %v363_v42 = vld [vmem:[%s3685_s4 + $0x210] sm:$0xff]  ;;  %v370_v45 = vld [vmem:[%s3685_s4 + $0x248] sm:$0xff] }
  0xb6   :  { %v301_v61 = vld [vmem:[%s3685_s4 + $0x20] sm:$0xff]  ;;  %v367_v44 = vld [vmem:[%s3685_s4 + $0x230] sm:$0xff]  ;;  %v374_v46 = vld [vmem:[%s3685_s4 + $0x268] sm:$0xff] }
  0xb8   :  { %1587 = vmatpush1.bf16.msra.mxu0 %v1586_v11  ;;  %1715 = vmatpush1.bf16.msra.mxu1 %v1714_v12  ;;  %v312_v11 = vld [vmem:[%s3685_s4 + $0x78] sm:$0xff]  ;;  %v1734_v12 = vpack.c.bf16 %v301_v61, %v297_v3  ;;  %v337_v3 = vld [vmem:[%s3685_s4 + $0x140] sm:$0xff] }
  0xb9   :  { %1589 = vmatprep.subr.bf16.mxu0 %v1588_v15  ;;  %1717 = vmatprep.subr.bf16.mxu1 %v1716_v16  ;;  %v309_v15 = vld [vmem:[%s3685_s4 + $0x60] sm:$0xff]  ;;  %v307_v16 = vld [vmem:[%s3685_s4 + $0x50] sm:$0xff]  ;;  %v1864_v19 = vpack.c.bf16 %v312_v11, %v308_v10  ;;  %v350_v10 = vld [vmem:[%s3685_s4 + $0x1a8] sm:$0xff] }
  0xba   :  { %v1738_v26 = vpack.c.bf16 %v309_v15, %v305_v14  ;;  %v1866_v27 = vpack.c.bf16 %v311_v21, %v307_v16  ;;  %v341_v61 = vld [vmem:[%s3685_s4 + $0x160] sm:$0xff]  ;;  %v348_v11 = vld [vmem:[%s3685_s4 + $0x198] sm:$0xff]  ;;  %v1882_v14 = vpack.c.bf16 %v343_v8, %v339_v6  ;;  %v1756_v15 = vpack.c.bf16 %v350_v10, %v346_v9  ;;  %v351_v21 = vld [vmem:[%s3685_s4 + $0x1b0] sm:$0xff] }
  0xbb   :  { %v345_v16 = vld [vmem:[%s3685_s4 + $0x180] sm:$0xff]  ;;  %v379_v6 = vld [vmem:[%s3685_s4 + $0x290] sm:$0xff]  ;;  %v386_v9 = vld [vmem:[%s3685_s4 + $0x2c8] sm:$0xff] }
  0xbc   :  { %1591 = vmatpush1.bf16.msra.mxu0 %v1590_v24  ;;  %1719 = vmatpush1.bf16.msra.mxu1 %v1718_v25  ;;  %v316_v24 = vld [vmem:[%s3685_s4 + $0x98] sm:$0xff]  ;;  %v383_v8 = vld [vmem:[%s3685_s4 + $0x2b0] sm:$0xff]  ;;  %v390_v10 = vld [vmem:[%s3685_s4 + $0x2e8] sm:$0xff] }
  0xbd   :  { %1593 = vmatprep.subr.bf16.mxu0 %v1592_v28  ;;  %1721 = vmatprep.subr.bf16.mxu1 %v1720_v29  ;;  %v320_v25 = vld [vmem:[%s3685_s4 + $0xb8] sm:$0xff]  ;;  %v1740_v28 = vpack.c.bf16 %v318_v23, %v314_v22  ;;  %v313_v29 = vld [vmem:[%s3685_s4 + $0x80] sm:$0xff]  ;;  %v354_v22 = vld [vmem:[%s3685_s4 + $0x1c8] sm:$0xff] }
  0xbe   :  { %v1868_v31 = vpack.c.bf16 %v320_v25, %v316_v24  ;;  %v358_v23 = vld [vmem:[%s3685_s4 + $0x1e8] sm:$0xff]  ;;  %v356_v24 = vld [vmem:[%s3685_s4 + $0x1d8] sm:$0xff] }
  0xbf   :  { %v360_v25 = vld [vmem:[%s3685_s4 + $0x1f8] sm:$0xff] }
  0xc0   :  { %1595 = vmatpush1.bf16.msra.mxu0 %v1594_v36  ;;  %1723 = vmatpush1.bf16.msra.mxu1 %v1722_v37  ;;  %v328_v36 = vld [vmem:[%s3685_s4 + $0xf8] sm:$0xff] }
  0xc1   :  { %1597 = vmatprep.subr.bf16.mxu0 %v1596_v40  ;;  %1725 = vmatprep.subr.bf16.mxu1 %v1724_v41  ;;  %v321_v40 = vld [vmem:[%s3685_s4 + $0xc0] sm:$0xff]  ;;  %v1872_v43 = vpack.c.bf16 %v328_v36, %v324_v35  ;;  %v364_v35 = vld [vmem:[%s3685_s4 + $0x218] sm:$0xff] }
  0xc2   :  { %v325_v41 = vld [vmem:[%s3685_s4 + $0xe0] sm:$0xff]  ;;  %v368_v36 = vld [vmem:[%s3685_s4 + $0x238] sm:$0xff] }
  0xc4   :  { %1599 = vmatpush1.bf16.msra.mxu0 %v1598_v48  ;;  %1727 = vmatpush1.bf16.msra.mxu1 %v1726_v49  ;;  %v336_v48 = vld [vmem:[%s3685_s4 + $0x138] sm:$0xff]  ;;  %v1746_v49 = vpack.c.bf16 %v325_v41, %v321_v40  ;;  %v361_v40 = vld [vmem:[%s3685_s4 + $0x200] sm:$0xff] }
  0xc5   :  { %1601 = vmatprep.subr.bf16.mxu0 %v1600_v52  ;;  %1729 = vmatprep.subr.bf16.mxu1 %v1728_v53  ;;  %v329_v52 = vld [vmem:[%s3685_s4 + $0x100] sm:$0xff]  ;;  %v1876_v55 = vpack.c.bf16 %v336_v48, %v332_v47  ;;  %v372_v47 = vld [vmem:[%s3685_s4 + $0x258] sm:$0xff] }
  0xc6   :  { %v333_v53 = vld [vmem:[%s3685_s4 + $0x120] sm:$0xff]  ;;  %v376_v48 = vld [vmem:[%s3685_s4 + $0x278] sm:$0xff] }
  0xc7   :  { %v365_v41 = vld [vmem:[%s3685_s4 + $0x220] sm:$0xff] }
  0xc8   :  { %1603 = vmatpush1.bf16.msra.mxu0 %v1602_v63  ;;  %1731 = vmatpush1.bf16.msra.mxu1 %v1730_v0  ;;  %v344_v63 = vld [vmem:[%s3685_s4 + $0x178] sm:$0xff]  ;;  %v1750_v0 = vpack.c.bf16 %v333_v53, %v329_v52  ;;  %v369_v52 = vld [vmem:[%s3685_s4 + $0x240] sm:$0xff] }
  0xc9   :  { %1733 = vmatprep.subr.bf16.mxu0 %v1732_v1  ;;  %1861 = vmatprep.subr.bf16.mxu1 %v1860_v2  ;;  %v1878_v1 = vpack.c.bf16 %v335_v56, %v331_v54  ;;  %v1752_v2 = vpack.c.bf16 %v342_v58, %v338_v57  ;;  %v1880_v7 = vpack.c.bf16 %v344_v63, %v340_v62  ;;  %v373_v53 = vld [vmem:[%s3685_s4 + $0x260] sm:$0xff]  ;;  %v371_v54 = vld [vmem:[%s3685_s4 + $0x250] sm:$0xff]  ;;  %v378_v57 = vld [vmem:[%s3685_s4 + $0x288] sm:$0xff] }
  0xca   :  { %v375_v56 = vld [vmem:[%s3685_s4 + $0x270] sm:$0xff]  ;;  %v382_v58 = vld [vmem:[%s3685_s4 + $0x2a8] sm:$0xff]  ;;  %v380_v62 = vld [vmem:[%s3685_s4 + $0x298] sm:$0xff] }
  0xcb   :  { %967 = vmatmul.mubr.f32.vlgmr.msra.gmra.mrb[0].mxu0 %v2529_v59  ;;  %1109 = vmatmul.mubr.f32.vlgmr.msra.gmra.mrb[0].mxu1 %v2529_v59  ;;  %v317_v59 = vld [vmem:[%s3685_s4 + $0xa0] sm:$0xff]  ;;  %v384_v63 = vld [vmem:[%s3685_s4 + $0x2b8] sm:$0xff] }
  0xcc   :  { %1735 = vmatpush1.bf16.msra.mxu0 %v1734_v12  ;;  %1201 = vmatprep.mubr.f32.mxu0 %v1131_v17  ;;  %v1742_v37 = vpack.c.bf16 %v317_v59, %v313_v29  ;;  %v352_v12 = vld [vmem:[%s3685_s4 + $0x1b8] sm:$0xff]  ;;  %v353_v29 = vld [vmem:[%s3685_s4 + $0x1c0] sm:$0xff] }
  0xcd   :  { %1863 = vmatpush1.bf16.msra.mxu1 %v1862_v13  ;;  %1343 = vmatprep.mubr.f32.mxu1 %v1131_v17  ;;  %v1754_v13 = vpack.c.bf16 %v341_v61, %v337_v3  ;;  %v349_v17 = vld [vmem:[%s3685_s4 + $0x1a0] sm:$0xff] }
  0xce   :  { %1737 = vmatprep.subr.bf16.mxu0 %v1736_v18  ;;  %1865 = vmatprep.subr.bf16.mxu1 %v1864_v19  ;;  %v347_v18 = vld [vmem:[%s3685_s4 + $0x190] sm:$0xff]  ;;  %v1884_v19 = vpack.c.bf16 %v352_v12, %v348_v11  ;;  %v357_v59 = vld [vmem:[%s3685_s4 + $0x1e0] sm:$0xff]  ;;  %v388_v11 = vld [vmem:[%s3685_s4 + $0x2d8] sm:$0xff] }
  0xcf   :  { %v377_v3 = vld [vmem:[%s3685_s4 + $0x280] sm:$0xff]  ;;  %v392_v12 = vld [vmem:[%s3685_s4 + $0x2f8] sm:$0xff] }
  0xd0   :  { %1739 = vmatpush1.bf16.msra.mxu0 %v1738_v26  ;;  %v1758_v26 = vpack.c.bf16 %v349_v17, %v345_v16  ;;  %v381_v61 = vld [vmem:[%s3685_s4 + $0x2a0] sm:$0xff] }
  0xd1   :  { %1867 = vmatpush1.bf16.msra.mxu1 %v1866_v27  ;;  %1741 = vmatprep.subr.bf16.mxu0 %v1740_v28  ;;  %v1886_v27 = vpack.c.bf16 %v351_v21, %v347_v18  ;;  %v1760_v28 = vpack.c.bf16 %v358_v23, %v354_v22  ;;  %v385_v16 = vld [vmem:[%s3685_s4 + $0x2c0] sm:$0xff]  ;;  %v387_v18 = vld [vmem:[%s3685_s4 + $0x2d0] sm:$0xff]  ;;  %v394_v22 = vld [vmem:[%s3685_s4 + $0x308] sm:$0xff] }
  0xd2   :  { %1869 = vmatprep.subr.bf16.mxu1 %v1868_v31  ;;  %v1888_v31 = vpack.c.bf16 %v360_v25, %v356_v24  ;;  %v389_v17 = vld [vmem:[%s3685_s4 + $0x2e0] sm:$0xff]  ;;  %v391_v21 = vld [vmem:[%s3685_s4 + $0x2f0] sm:$0xff]  ;;  %v398_v23 = vld [vmem:[%s3685_s4 + $0x328] sm:$0xff] }
  0xd3   :  { %v396_v24 = vld [vmem:[%s3685_s4 + $0x318] sm:$0xff] }
  0xd4   :  { %1743 = vmatpush1.bf16.msra.mxu0 %v1742_v37  ;;  %v1762_v37 = vpack.c.bf16 %v357_v59, %v353_v29  ;;  %v400_v25 = vld [vmem:[%s3685_s4 + $0x338] sm:$0xff]  ;;  %v393_v29 = vld [vmem:[%s3685_s4 + $0x300] sm:$0xff] }
  0xd5   :  { %1871 = vmatpush1.bf16.msra.mxu1 %v1870_v38  ;;  %1745 = vmatprep.subr.bf16.mxu0 %v1744_v39  ;;  %v1890_v38 = vpack.c.bf16 %v359_v32, %v355_v30  ;;  %v1764_v39 = vpack.c.bf16 %v366_v34, %v362_v33  ;;  %v397_v59 = vld [vmem:[%s3685_s4 + $0x320] sm:$0xff]  ;;  %v395_v30 = vld [vmem:[%s3685_s4 + $0x310] sm:$0xff]  ;;  %v402_v33 = vld [vmem:[%s3685_s4 + $0x348] sm:$0xff] }
  0xd6   :  { %1873 = vmatprep.subr.bf16.mxu1 %v1872_v43  ;;  %v1892_v43 = vpack.c.bf16 %v368_v36, %v364_v35  ;;  %v399_v32 = vld [vmem:[%s3685_s4 + $0x330] sm:$0xff]  ;;  %v406_v34 = vld [vmem:[%s3685_s4 + $0x368] sm:$0xff]  ;;  %v404_v35 = vld [vmem:[%s3685_s4 + $0x358] sm:$0xff] }
  0xd7   :  { %v408_v36 = vld [vmem:[%s3685_s4 + $0x378] sm:$0xff] }
  0xd8   :  { %1747 = vmatpush1.bf16.msra.mxu0 %v1746_v49  ;;  %v1766_v49 = vpack.c.bf16 %v365_v41, %v361_v40  ;;  %v401_v40 = vld [vmem:[%s3685_s4 + $0x340] sm:$0xff] }
  0xd9   :  { %1875 = vmatpush1.bf16.msra.mxu1 %v1874_v50  ;;  %1749 = vmatprep.subr.bf16.mxu0 %v1748_v51  ;;  %v1894_v50 = vpack.c.bf16 %v367_v44, %v363_v42  ;;  %v1768_v51 = vpack.c.bf16 %v374_v46, %v370_v45  ;;  %v405_v41 = vld [vmem:[%s3685_s4 + $0x360] sm:$0xff]  ;;  %v403_v42 = vld [vmem:[%s3685_s4 + $0x350] sm:$0xff]  ;;  %v410_v45 = vld [vmem:[%s3685_s4 + $0x388] sm:$0xff] }
  0xda   :  { %1877 = vmatprep.subr.bf16.mxu1 %v1876_v55  ;;  %v1896_v55 = vpack.c.bf16 %v376_v48, %v372_v47  ;;  %v407_v44 = vld [vmem:[%s3685_s4 + $0x370] sm:$0xff]  ;;  %v414_v46 = vld [vmem:[%s3685_s4 + $0x3a8] sm:$0xff]  ;;  %v412_v47 = vld [vmem:[%s3685_s4 + $0x398] sm:$0xff] }
  0xdb   :  { %v416_v48 = vld [vmem:[%s3685_s4 + $0x3b8] sm:$0xff] }
  0xdc   :  { %1751 = vmatpush1.bf16.msra.mxu0 %v1750_v0  ;;  %v1770_v0 = vpack.c.bf16 %v373_v53, %v369_v52  ;;  %v409_v52 = vld [vmem:[%s3685_s4 + $0x380] sm:$0xff] }
  0xdd   :  { %1879 = vmatpush1.bf16.msra.mxu1 %v1878_v1  ;;  %1753 = vmatprep.subr.bf16.mxu0 %v1752_v2  ;;  %v1898_v1 = vpack.c.bf16 %v375_v56, %v371_v54  ;;  %v1772_v2 = vpack.c.bf16 %v382_v58, %v378_v57  ;;  %v413_v53 = vld [vmem:[%s3685_s4 + $0x3a0] sm:$0xff]  ;;  %v411_v54 = vld [vmem:[%s3685_s4 + $0x390] sm:$0xff]  ;;  %v418_v57 = vld [vmem:[%s3685_s4 + $0x3c8] sm:$0xff] }
  0xde   :  { %1881 = vmatprep.subr.bf16.mxu1 %v1880_v7  ;;  %v1900_v7 = vpack.c.bf16 %v384_v63, %v380_v62  ;;  %v415_v56 = vld [vmem:[%s3685_s4 + $0x3b0] sm:$0xff]  ;;  %v422_v58 = vld [vmem:[%s3685_s4 + $0x3e8] sm:$0xff]  ;;  %v420_v62 = vld [vmem:[%s3685_s4 + $0x3d8] sm:$0xff] }
  0xdf   :  { %v424_v63 = vld [vmem:[%s3685_s4 + $0x3f8] sm:$0xff] }
  0xe0   :  { %1755 = vmatpush1.bf16.msra.mxu0 %v1754_v13  ;;  %v1774_v13 = vpack.c.bf16 %v381_v61, %v377_v3  ;;  %v417_v3 = vld [vmem:[%s3685_s4 + $0x3c0] sm:$0xff] }
  0xe1   :  { %1883 = vmatpush1.bf16.msra.mxu1 %v1882_v14  ;;  %1757 = vmatprep.subr.bf16.mxu0 %v1756_v15  ;;  %v1902_v14 = vpack.c.bf16 %v383_v8, %v379_v6  ;;  %v1776_v15 = vpack.c.bf16 %v390_v10, %v386_v9  ;;  %v421_v61 = vld [vmem:[%s3685_s4 + $0x3e0] sm:$0xff]  ;;  %v419_v6 = vld [vmem:[%s3685_s4 + $0x3d0] sm:$0xff]  ;;  %v426_v9 = vld [vmem:[%s3685_s4 + $0x408] sm:$0xff] }
  0xe2   :  { %1885 = vmatprep.subr.bf16.mxu1 %v1884_v19  ;;  %v1904_v19 = vpack.c.bf16 %v392_v12, %v388_v11  ;;  %v423_v8 = vld [vmem:[%s3685_s4 + $0x3f0] sm:$0xff]  ;;  %v430_v10 = vld [vmem:[%s3685_s4 + $0x428] sm:$0xff]  ;;  %v1116_v11 = vcombine.high %v2531_v60, %v2531_v60  ;;  %v428_v12 = vld [vmem:[%s3685_s4 + $0x418] sm:$0xff] }
  0xe3   :  { %v429_v60 = vld [vmem:[%s3685_s4 + $0x420] sm:$0xff] }
  0xe4   :  { %1759 = vmatpush1.bf16.msra.mxu0 %v1758_v26  ;;  %v1778_v26 = vpack.c.bf16 %v389_v17, %v385_v16  ;;  %v1796_v16 = vpack.c.bf16 %v430_v10, %v426_v9  ;;  %v425_v17 = vld [vmem:[%s3685_s4 + $0x400] sm:$0xff]  ;;  %v466_v9 = vld [vmem:[%s3685_s4 + $0x548] sm:$0xff] }
  0xe5   :  { %1887 = vmatpush1.bf16.msra.mxu1 %v1886_v27  ;;  %1761 = vmatprep.subr.bf16.mxu0 %v1760_v28  ;;  %v1906_v27 = vpack.c.bf16 %v391_v21, %v387_v18  ;;  %v1780_v28 = vpack.c.bf16 %v398_v23, %v394_v22  ;;  %v431_v21 = vld [vmem:[%s3685_s4 + $0x430] sm:$0xff]  ;;  %v3302_v22 = vrot.slane %v1116_v11, %v2484_v20  ;;  %v434_v23 = vld [vmem:[%s3685_s4 + $0x448] sm:$0xff]  ;;  %v468_v11 = vld [vmem:[%s3685_s4 + $0x558] sm:$0xff] }
  0xe6   :  { %1889 = vmatprep.subr.bf16.mxu1 %v1888_v31  ;;  %v1908_v31 = vpack.c.bf16 %v400_v25, %v396_v24  ;;  %v438_v24 = vld [vmem:[%s3685_s4 + $0x468] sm:$0xff]  ;;  %v1798_v25 = vpack.c.bf16 %v429_v60, %v425_v17  ;;  %v469_v17 = vld [vmem:[%s3685_s4 + $0x560] sm:$0xff]  ;;  %v467_v60 = vld [vmem:[%s3685_s4 + $0x550] sm:$0xff] }
  0xe7   :  { %v470_v10 = vld [vmem:[%s3685_s4 + $0x568] sm:$0xff] }
  0xe8   :  { %1763 = vmatpush1.bf16.msra.mxu0 %v1762_v37  ;;  %v1782_v37 = vpack.c.bf16 %v397_v59, %v393_v29  ;;  %v437_v29 = vld [vmem:[%s3685_s4 + $0x460] sm:$0xff]  ;;  %v435_v59 = vld [vmem:[%s3685_s4 + $0x450] sm:$0xff] }
  0xe9   :  { %1891 = vmatpush1.bf16.msra.mxu1 %v1890_v38  ;;  %1765 = vmatprep.subr.bf16.mxu0 %v1764_v39  ;;  %v1910_v38 = vpack.c.bf16 %v399_v32, %v395_v30  ;;  %v1784_v39 = vpack.c.bf16 %v406_v34, %v402_v33  ;;  %v1800_v30 = vpack.c.bf16 %v438_v24, %v434_v23  ;;  %v442_v32 = vld [vmem:[%s3685_s4 + $0x488] sm:$0xff]  ;;  %v476_v24 = vld [vmem:[%s3685_s4 + $0x598] sm:$0xff] }
  0xea   :  { %1893 = vmatprep.subr.bf16.mxu1 %v1892_v43  ;;  %v1912_v43 = vpack.c.bf16 %v408_v36, %v404_v35  ;;  %v446_v33 = vld [vmem:[%s3685_s4 + $0x4a8] sm:$0xff]  ;;  %v1132_v34 = vcombine.high %v3302_v22, %v3302_v22  ;;  %v444_v36 = vld [vmem:[%s3685_s4 + $0x498] sm:$0xff] }
  0xeb   :  { %v478_v23 = vld [vmem:[%s3685_s4 + $0x5a8] sm:$0xff] }
  0xec   :  { %1767 = vmatpush1.bf16.msra.mxu0 %v1766_v49  ;;  %v1786_v49 = vpack.c.bf16 %v405_v41, %v401_v40  ;;  %v1804_v40 = vpack.c.bf16 %v446_v33, %v442_v32  ;;  %v441_v41 = vld [vmem:[%s3685_s4 + $0x480] sm:$0xff]  ;;  %v482_v32 = vld [vmem:[%s3685_s4 + $0x5c8] sm:$0xff] }
  0xed   :  { %1895 = vmatpush1.bf16.msra.mxu1 %v1894_v50  ;;  %1769 = vmatprep.subr.bf16.mxu0 %v1768_v51  ;;  %v1914_v50 = vpack.c.bf16 %v407_v44, %v403_v42  ;;  %v1788_v51 = vpack.c.bf16 %v414_v46, %v410_v45  ;;  %v445_v42 = vld [vmem:[%s3685_s4 + $0x4a0] sm:$0xff]  ;;  %v447_v44 = vld [vmem:[%s3685_s4 + $0x4b0] sm:$0xff]  ;;  %v450_v45 = vld [vmem:[%s3685_s4 + $0x4c8] sm:$0xff] }
  0xee   :  { %1897 = vmatprep.subr.bf16.mxu1 %v1896_v55  ;;  %v1916_v55 = vpack.c.bf16 %v416_v48, %v412_v47  ;;  %v454_v46 = vld [vmem:[%s3685_s4 + $0x4e8] sm:$0xff]  ;;  %v452_v47 = vld [vmem:[%s3685_s4 + $0x4d8] sm:$0xff] }
  0xef   :  { %v456_v48 = vld [vmem:[%s3685_s4 + $0x4f8] sm:$0xff]  ;;  %v486_v33 = vld [vmem:[%s3685_s4 + $0x5e8] sm:$0xff] }
  0xf0   :  { %1771 = vmatpush1.bf16.msra.mxu0 %v1770_v0  ;;  %v1790_v0 = vpack.c.bf16 %v413_v53, %v409_v52  ;;  %v449_v52 = vld [vmem:[%s3685_s4 + $0x4c0] sm:$0xff] }
  0xf1   :  { %1899 = vmatpush1.bf16.msra.mxu1 %v1898_v1  ;;  %1773 = vmatprep.subr.bf16.mxu0 %v1772_v2  ;;  %v1918_v1 = vpack.c.bf16 %v415_v56, %v411_v54  ;;  %v1792_v2 = vpack.c.bf16 %v422_v58, %v418_v57  ;;  %v453_v53 = vld [vmem:[%s3685_s4 + $0x4e0] sm:$0xff]  ;;  %v451_v54 = vld [vmem:[%s3685_s4 + $0x4d0] sm:$0xff]  ;;  %v458_v57 = vld [vmem:[%s3685_s4 + $0x508] sm:$0xff] }
  0xf2   :  { %1901 = vmatprep.subr.bf16.mxu1 %v1900_v7  ;;  %v1920_v7 = vpack.c.bf16 %v424_v63, %v420_v62  ;;  %v455_v56 = vld [vmem:[%s3685_s4 + $0x4f0] sm:$0xff]  ;;  %v462_v58 = vld [vmem:[%s3685_s4 + $0x528] sm:$0xff]  ;;  %v460_v62 = vld [vmem:[%s3685_s4 + $0x518] sm:$0xff] }
  0xf3   :  { %v464_v63 = vld [vmem:[%s3685_s4 + $0x538] sm:$0xff] }
  0xf4   :  { %1775 = vmatpush1.bf16.msra.mxu0 %v1774_v13  ;;  %v432_v13 = vld [vmem:[%s3685_s4 + $0x438] sm:$0xff] }
  0xf5   :  { %1903 = vmatpush1.bf16.msra.mxu1 %v1902_v14  ;;  %1777 = vmatprep.subr.bf16.mxu0 %v1776_v15  ;;  %v1794_v14 = vpack.c.bf16 %v421_v61, %v417_v3  ;;  %v1922_v15 = vpack.c.bf16 %v423_v8, %v419_v6  ;;  %v1924_v18 = vpack.c.bf16 %v432_v13, %v428_v12  ;;  %v457_v3 = vld [vmem:[%s3685_s4 + $0x500] sm:$0xff]  ;;  %v459_v6 = vld [vmem:[%s3685_s4 + $0x510] sm:$0xff]  ;;  %v472_v12 = vld [vmem:[%s3685_s4 + $0x578] sm:$0xff] }
  0xf6   :  { %1905 = vmatprep.subr.bf16.mxu1 %v1904_v19  ;;  %v427_v19 = vld [vmem:[%s3685_s4 + $0x410] sm:$0xff]  ;;  %v461_v61 = vld [vmem:[%s3685_s4 + $0x520] sm:$0xff] }
  0xf7   :  { %v1926_v20 = vpack.c.bf16 %v431_v21, %v427_v19  ;;  %v463_v8 = vld [vmem:[%s3685_s4 + $0x530] sm:$0xff]  ;;  %v1814_v13 = vpack.c.bf16 %v461_v61, %v457_v3  ;;  %v474_v21 = vld [vmem:[%s3685_s4 + $0x588] sm:$0xff] }
  0xf8   :  { %1779 = vmatpush1.bf16.msra.mxu0 %v1778_v26  ;;  %v436_v26 = vld [vmem:[%s3685_s4 + $0x458] sm:$0xff]  ;;  %v471_v19 = vld [vmem:[%s3685_s4 + $0x570] sm:$0xff] }
  0xf9   :  { %1907 = vmatpush1.bf16.msra.mxu1 %v1906_v27  ;;  %1781 = vmatprep.subr.bf16.mxu0 %v1780_v28  ;;  %v440_v27 = vld [vmem:[%s3685_s4 + $0x478] sm:$0xff]  ;;  %v433_v28 = vld [vmem:[%s3685_s4 + $0x440] sm:$0xff]  ;;  %v499_v3 = vld [vmem:[%s3685_s4 + $0x650] sm:$0xff] }
  0xfa   :  { %1909 = vmatprep.subr.bf16.mxu1 %v1908_v31  ;;  %v439_v31 = vld [vmem:[%s3685_s4 + $0x470] sm:$0xff]  ;;  %v1928_v35 = vpack.c.bf16 %v440_v27, %v436_v26  ;;  %v1946_v27 = vpack.c.bf16 %v471_v19, %v467_v60  ;;  %v518_v19 = vld [vmem:[%s3685_s4 + $0x6e8] sm:$0xff] }
  0xfb   :  { %v511_v60 = vld [vmem:[%s3685_s4 + $0x6b0] sm:$0xff] }
  0xfc   :  { %1783 = vmatpush1.bf16.msra.mxu0 %v1782_v37  ;;  %v448_v37 = vld [vmem:[%s3685_s4 + $0x4b8] sm:$0xff] }
  0xfd   :  { %1911 = vmatpush1.bf16.msra.mxu1 %v1910_v38  ;;  %1785 = vmatprep.subr.bf16.mxu0 %v1784_v39  ;;  %v1802_v38 = vpack.c.bf16 %v437_v29, %v433_v28  ;;  %v1930_v39 = vpack.c.bf16 %v439_v31, %v435_v59  ;;  %v473_v28 = vld [vmem:[%s3685_s4 + $0x580] sm:$0xff]  ;;  %v475_v59 = vld [vmem:[%s3685_s4 + $0x590] sm:$0xff] }
  0xfe   :  { %1913 = vmatprep.subr.bf16.mxu1 %v1912_v43  ;;  %v443_v43 = vld [vmem:[%s3685_s4 + $0x490] sm:$0xff]  ;;  %v477_v29 = vld [vmem:[%s3685_s4 + $0x5a0] sm:$0xff] }
  0xff   :  { %v479_v31 = vld [vmem:[%s3685_s4 + $0x5b0] sm:$0xff] }
 0x100   :  { %1787 = vmatpush1.bf16.msra.mxu0 %v1786_v49  ;;  %v1806_v49 = vpack.c.bf16 %v445_v42, %v441_v41  ;;  %v483_v41 = vld [vmem:[%s3685_s4 + $0x5d0] sm:$0xff] }
 0x101   :  { %1915 = vmatpush1.bf16.msra.mxu1 %v1914_v50  ;;  %1789 = vmatprep.subr.bf16.mxu0 %v1788_v51  ;;  %v1934_v50 = vpack.c.bf16 %v447_v44, %v443_v43  ;;  %v1808_v51 = vpack.c.bf16 %v454_v46, %v450_v45  ;;  %v487_v43 = vld [vmem:[%s3685_s4 + $0x5f0] sm:$0xff]  ;;  %v494_v44 = vld [vmem:[%s3685_s4 + $0x628] sm:$0xff]  ;;  %v492_v45 = vld [vmem:[%s3685_s4 + $0x618] sm:$0xff] }
 0x102   :  { %1917 = vmatprep.subr.bf16.mxu1 %v1916_v55  ;;  %v1936_v55 = vpack.c.bf16 %v456_v48, %v452_v47  ;;  %v496_v46 = vld [vmem:[%s3685_s4 + $0x638] sm:$0xff]  ;;  %v1954_v48 = vpack.c.bf16 %v487_v43, %v483_v41  ;;  %v527_v41 = vld [vmem:[%s3685_s4 + $0x730] sm:$0xff]  ;;  %v534_v43 = vld [vmem:[%s3685_s4 + $0x768] sm:$0xff] }
 0x104   :  { %1791 = vmatpush1.bf16.msra.mxu0 %v1790_v0  ;;  %v1810_v0 = vpack.c.bf16 %v453_v53, %v449_v52  ;;  %v491_v52 = vld [vmem:[%s3685_s4 + $0x610] sm:$0xff]  ;;  %v1956_v53 = vpack.c.bf16 %v496_v46, %v492_v45 }
 0x105   :  { %1919 = vmatpush1.bf16.msra.mxu1 %v1918_v1  ;;  %1793 = vmatprep.subr.bf16.mxu0 %v1792_v2  ;;  %v1938_v1 = vpack.c.bf16 %v455_v56, %v451_v54  ;;  %v1812_v2 = vpack.c.bf16 %v462_v58, %v458_v57  ;;  %v495_v54 = vld [vmem:[%s3685_s4 + $0x630] sm:$0xff]  ;;  %v502_v56 = vld [vmem:[%s3685_s4 + $0x668] sm:$0xff]  ;;  %v500_v57 = vld [vmem:[%s3685_s4 + $0x658] sm:$0xff] }
 0x106   :  { %1921 = vmatprep.subr.bf16.mxu1 %v1920_v7  ;;  %v1940_v7 = vpack.c.bf16 %v464_v63, %v460_v62  ;;  %v504_v58 = vld [vmem:[%s3685_s4 + $0x678] sm:$0xff]  ;;  %v1958_v63 = vpack.c.bf16 %v495_v54, %v491_v52  ;;  %v535_v52 = vld [vmem:[%s3685_s4 + $0x770] sm:$0xff]  ;;  %v542_v54 = vld [vmem:[%s3685_s4 + $0x7a8] sm:$0xff] }
 0x107   :  { %v1960_v61 = vpack.c.bf16 %v504_v58, %v500_v57 }
 0x108   :  { %1795 = vmatpush1.bf16.msra.mxu0 %v1794_v14  ;;  %v1942_v14 = vpack.c.bf16 %v463_v8, %v459_v6  ;;  %v503_v6 = vld [vmem:[%s3685_s4 + $0x670] sm:$0xff]  ;;  %v510_v8 = vld [vmem:[%s3685_s4 + $0x6a8] sm:$0xff] }
 0x109   :  { %1923 = vmatpush1.bf16.msra.mxu1 %v1922_v15  ;;  %1797 = vmatprep.subr.bf16.mxu0 %v1796_v16  ;;  %v1816_v15 = vpack.c.bf16 %v470_v10, %v466_v9  ;;  %v465_v16 = vld [vmem:[%s3685_s4 + $0x540] sm:$0xff]  ;;  %v508_v9 = vld [vmem:[%s3685_s4 + $0x698] sm:$0xff] }
 0x10a   :  { %1925 = vmatprep.subr.bf16.mxu1 %v1924_v18  ;;  %v1944_v18 = vpack.c.bf16 %v472_v12, %v468_v11  ;;  %v1818_v26 = vpack.c.bf16 %v469_v17, %v465_v16  ;;  %v512_v10 = vld [vmem:[%s3685_s4 + $0x6b8] sm:$0xff]  ;;  %v1962_v12 = vpack.c.bf16 %v503_v6, %v499_v3  ;;  %v507_v16 = vld [vmem:[%s3685_s4 + $0x690] sm:$0xff]  ;;  %v550_v6 = vld [vmem:[%s3685_s4 + $0x7e8] sm:$0xff] }
 0x10b   :  { %1202 = vmatmul.mubr.f32.vlgmr.msra.gmra.mrb[0].mxu0 %v2903_v5  ;;  %v1964_v17 = vpack.c.bf16 %v512_v10, %v508_v9  ;;  %v543_v3 = vld [vmem:[%s3685_s4 + $0x7b0] sm:$0xff] }
 0x10c   :  { %1344 = vmatmul.mubr.f32.vlgmr.msra.gmra.mrb[0].mxu1 %v2903_v5  ;;  %1799 = vmatpush1.bf16.msra.mxu0 %v1798_v25  ;;  %v1932_v5 = vpack.c.bf16 %v448_v37, %v444_v36  ;;  %v480_v25 = vld [vmem:[%s3685_s4 + $0x5b8] sm:$0xff]  ;;  %v1822_v36 = vpack.c.bf16 %v477_v29, %v473_v28  ;;  %v1950_v37 = vpack.c.bf16 %v479_v31, %v475_v59  ;;  %v515_v28 = vld [vmem:[%s3685_s4 + $0x6d0] sm:$0xff]  ;;  %v526_v31 = vld [vmem:[%s3685_s4 + $0x728] sm:$0xff] }
 0x10d   :  { %1272 = vmatprep.mubr.f32.mxu0 %v1132_v34  ;;  %1927 = vmatpush1.bf16.msra.mxu1 %v1926_v20  ;;  %v1820_v20 = vpack.c.bf16 %v478_v23, %v474_v21  ;;  %v516_v21 = vld [vmem:[%s3685_s4 + $0x6d8] sm:$0xff]  ;;  %v519_v59 = vld [vmem:[%s3685_s4 + $0x6f0] sm:$0xff] }
 0x10e   :  { %1414 = vmatprep.mubr.f32.mxu1 %v1132_v34  ;;  %1801 = vmatprep.subr.bf16.mxu0 %v1800_v30  ;;  %v1948_v30 = vpack.c.bf16 %v480_v25, %v476_v24  ;;  %v484_v34 = vld [vmem:[%s3685_s4 + $0x5d8] sm:$0xff]  ;;  %v1966_v25 = vpack.c.bf16 %v511_v60, %v507_v16  ;;  %v551_v16 = vld [vmem:[%s3685_s4 + $0x7f0] sm:$0xff] }
 0x10f   :  { %1929 = vmatprep.subr.bf16.mxu1 %v1928_v35  ;;  %v488_v35 = vld [vmem:[%s3685_s4 + $0x5f8] sm:$0xff] }
 0x110   :  { %1803 = vmatpush1.bf16.msra.mxu0 %v1802_v38  ;;  %v1824_v38 = vpack.c.bf16 %v486_v33, %v482_v32  ;;  %v1952_v42 = vpack.c.bf16 %v488_v35, %v484_v34  ;;  %v520_v23 = vld [vmem:[%s3685_s4 + $0x6f8] sm:$0xff]  ;;  %v1970_v35 = vpack.c.bf16 %v519_v59, %v515_v28 }
 0x111   :  { %1931 = vmatpush1.bf16.msra.mxu1 %v1930_v39  ;;  %1805 = vmatprep.subr.bf16.mxu0 %v1804_v40  ;;  %v481_v39 = vld [vmem:[%s3685_s4 + $0x5c0] sm:$0xff]  ;;  %v1968_v29 = vpack.c.bf16 %v520_v23, %v516_v21  ;;  %v524_v32 = vld [vmem:[%s3685_s4 + $0x718] sm:$0xff]  ;;  %v1437_v21 = vsub.s32 2, %v2475_v4  ;;  %v1433_v23 = vsub.s32 1, %v2475_v4 }
 0x112   :  { %1933 = vmatprep.subr.bf16.mxu1 %v1932_v5  ;;  %v485_v40 = vld [vmem:[%s3685_s4 + $0x5e0] sm:$0xff]  ;;  %v490_v5 = vld [vmem:[%s3685_s4 + $0x608] sm:$0xff]  ;;  %v528_v33 = vld [vmem:[%s3685_s4 + $0x738] sm:$0xff] }
 0x113   :  { %v1826_v47 = vpack.c.bf16 %v485_v40, %v481_v39  ;;  %v523_v39 = vld [vmem:[%s3685_s4 + $0x710] sm:$0xff]  ;;  %v1972_v40 = vpack.c.bf16 %v528_v33, %v524_v32 }
 0x114   :  { %1807 = vmatpush1.bf16.msra.mxu0 %v1806_v49  ;;  %v1828_v49 = vpack.c.bf16 %v494_v44, %v490_v5  ;;  %v532_v5 = vld [vmem:[%s3685_s4 + $0x758] sm:$0xff]  ;;  %v1974_v46 = vpack.c.bf16 %v527_v41, %v523_v39 }
 0x115   :  { %1935 = vmatpush1.bf16.msra.mxu1 %v1934_v50  ;;  %1809 = vmatprep.subr.bf16.mxu0 %v1808_v51  ;;  %v489_v50 = vld [vmem:[%s3685_s4 + $0x600] sm:$0xff]  ;;  %v536_v44 = vld [vmem:[%s3685_s4 + $0x778] sm:$0xff] }
 0x116   :  { %1937 = vmatprep.subr.bf16.mxu1 %v1936_v55  ;;  %v493_v51 = vld [vmem:[%s3685_s4 + $0x620] sm:$0xff]  ;;  %v498_v55 = vld [vmem:[%s3685_s4 + $0x648] sm:$0xff] }
 0x117   :  { %v1830_v62 = vpack.c.bf16 %v493_v51, %v489_v50  ;;  %v531_v50 = vld [vmem:[%s3685_s4 + $0x750] sm:$0xff]  ;;  %v1976_v51 = vpack.c.bf16 %v536_v44, %v532_v5 }
 0x118   :  { %1811 = vmatpush1.bf16.msra.mxu0 %v1810_v0  ;;  %v1832_v0 = vpack.c.bf16 %v502_v56, %v498_v55  ;;  %v540_v55 = vld [vmem:[%s3685_s4 + $0x798] sm:$0xff]  ;;  %v1978_v58 = vpack.c.bf16 %v535_v52, %v531_v50 }
 0x119   :  { %1939 = vmatpush1.bf16.msra.mxu1 %v1938_v1  ;;  %1813 = vmatprep.subr.bf16.mxu0 %v1812_v2  ;;  %v497_v1 = vld [vmem:[%s3685_s4 + $0x640] sm:$0xff]  ;;  %v544_v56 = vld [vmem:[%s3685_s4 + $0x7b8] sm:$0xff] }
 0x11a   :  { %1941 = vmatprep.subr.bf16.mxu1 %v1940_v7  ;;  %v501_v2 = vld [vmem:[%s3685_s4 + $0x660] sm:$0xff]  ;;  %v506_v7 = vld [vmem:[%s3685_s4 + $0x688] sm:$0xff] }
 0x11b   :  { %v1834_v11 = vpack.c.bf16 %v501_v2, %v497_v1  ;;  %v539_v1 = vld [vmem:[%s3685_s4 + $0x790] sm:$0xff]  ;;  %v1980_v2 = vpack.c.bf16 %v544_v56, %v540_v55 }
 0x11c   :  { %1815 = vmatpush1.bf16.msra.mxu0 %v1814_v13  ;;  %v1836_v13 = vpack.c.bf16 %v510_v8, %v506_v7  ;;  %v548_v7 = vld [vmem:[%s3685_s4 + $0x7d8] sm:$0xff]  ;;  %v1982_v10 = vpack.c.bf16 %v543_v3, %v539_v1 }
 0x11d   :  { %1943 = vmatpush1.bf16.msra.mxu1 %v1942_v14  ;;  %1817 = vmatprep.subr.bf16.mxu0 %v1816_v15  ;;  %v505_v14 = vld [vmem:[%s3685_s4 + $0x680] sm:$0xff]  ;;  %v552_v8 = vld [vmem:[%s3685_s4 + $0x7f8] sm:$0xff] }
 0x11e   :  { %1945 = vmatprep.subr.bf16.mxu1 %v1944_v18  ;;  %v509_v15 = vld [vmem:[%s3685_s4 + $0x6a0] sm:$0xff]  ;;  %v514_v18 = vld [vmem:[%s3685_s4 + $0x6c8] sm:$0xff] }
 0x11f   :  { %v1838_v24 = vpack.c.bf16 %v509_v15, %v505_v14  ;;  %v1984_v14 = vpack.c.bf16 %v552_v8, %v548_v7  ;;  %v547_v15 = vld [vmem:[%s3685_s4 + $0x7d0] sm:$0xff] }
 0x120   :  { %1819 = vmatpush1.bf16.msra.mxu0 %v1818_v26  ;;  %v1840_v26 = vpack.c.bf16 %v518_v19, %v514_v18  ;;  %v1986_v60 = vpack.c.bf16 %v551_v16, %v547_v15  ;;  %v1429_v18 = vsub.s32 0, %v2475_v4  ;;  %v1425_v19 = vld [vmem:[%s3686_s6] sm:$0xf] }
 0x121   :  { %1947 = vmatpush1.bf16.msra.mxu1 %v1946_v27  ;;  %1821 = vmatprep.subr.bf16.mxu0 %v1820_v20  ;;  %v513_v27 = vld [vmem:[%s3685_s4 + $0x6c0] sm:$0xff] }
 0x122   :  { %1949 = vmatprep.subr.bf16.mxu1 %v1948_v30  ;;  %v517_v20 = vld [vmem:[%s3685_s4 + $0x6e0] sm:$0xff]  ;;  %v522_v30 = vld [vmem:[%s3685_s4 + $0x708] sm:$0xff] }
 0x123   :  { %v1842_v34 = vpack.c.bf16 %v517_v20, %v513_v27  ;;  %v1438_v27 = vrot.slane %v1425_v19, %v1437_v21  ;;  %v1434_v20 = vrot.slane %v1425_v19, %v1433_v23 }
 0x124   :  { %1823 = vmatpush1.bf16.msra.mxu0 %v1822_v36  ;;  %v1844_v36 = vpack.c.bf16 %v526_v31, %v522_v30 }
 0x125   :  { %1951 = vmatpush1.bf16.msra.mxu1 %v1950_v37  ;;  %1825 = vmatprep.subr.bf16.mxu0 %v1824_v38  ;;  %v521_v37 = vld [vmem:[%s3685_s4 + $0x700] sm:$0xff] }
 0x126   :  { %1953 = vmatprep.subr.bf16.mxu1 %v1952_v42  ;;  %v525_v38 = vld [vmem:[%s3685_s4 + $0x720] sm:$0xff]  ;;  %v530_v42 = vld [vmem:[%s3685_s4 + $0x748] sm:$0xff] }
 0x127   :  { %v1846_v45 = vpack.c.bf16 %v525_v38, %v521_v37 }
 0x128   :  { %1827 = vmatpush1.bf16.msra.mxu0 %v1826_v47  ;;  %v1848_v47 = vpack.c.bf16 %v534_v43, %v530_v42 }
 0x129   :  { %1955 = vmatpush1.bf16.msra.mxu1 %v1954_v48  ;;  %1829 = vmatprep.subr.bf16.mxu0 %v1828_v49  ;;  %v529_v48 = vld [vmem:[%s3685_s4 + $0x740] sm:$0xff] }
 0x12a   :  { %1957 = vmatprep.subr.bf16.mxu1 %v1956_v53  ;;  %v533_v49 = vld [vmem:[%s3685_s4 + $0x760] sm:$0xff]  ;;  %v538_v53 = vld [vmem:[%s3685_s4 + $0x788] sm:$0xff] }
 0x12b   :  { %v1850_v57 = vpack.c.bf16 %v533_v49, %v529_v48 }
 0x12c   :  { %1831 = vmatpush1.bf16.msra.mxu0 %v1830_v62  ;;  %v1852_v62 = vpack.c.bf16 %v542_v54, %v538_v53 }
 0x12d   :  { %1959 = vmatpush1.bf16.msra.mxu1 %v1958_v63  ;;  %1833 = vmatprep.subr.bf16.mxu0 %v1832_v0  ;;  %v537_v63 = vld [vmem:[%s3685_s4 + $0x780] sm:$0xff] }
 0x12e   :  { %1961 = vmatprep.subr.bf16.mxu1 %v1960_v61  ;;  %v541_v0 = vld [vmem:[%s3685_s4 + $0x7a0] sm:$0xff]  ;;  %v546_v61 = vld [vmem:[%s3685_s4 + $0x7c8] sm:$0xff] }
 0x12f   :  { %v1854_v9 = vpack.c.bf16 %v541_v0, %v537_v63 }
 0x130   :  { %1835 = vmatpush1.bf16.msra.mxu0 %v1834_v11  ;;  %v1856_v11 = vpack.c.bf16 %v550_v6, %v546_v61 }
 0x131   :  { %1963 = vmatpush1.bf16.msra.mxu1 %v1962_v12  ;;  %1837 = vmatprep.subr.bf16.mxu0 %v1836_v13  ;;  %v545_v12 = vld [vmem:[%s3685_s4 + $0x7c0] sm:$0xff] }
 0x132   :  { %1965 = vmatprep.subr.bf16.mxu1 %v1964_v17  ;;  %v549_v13 = vld [vmem:[%s3685_s4 + $0x7e0] sm:$0xff] }
 0x133   :  { %v1858_v17 = vpack.c.bf16 %v549_v13, %v545_v12 }
 0x134   :  { %1839 = vmatpush1.bf16.msra.mxu0 %v1838_v24  ;;  %v1441_v24 = vsub.s32 3, %v2475_v4 }
 0x135   :  { %1967 = vmatpush1.bf16.msra.mxu1 %v1966_v25  ;;  %1841 = vmatprep.subr.bf16.mxu0 %v1840_v26  ;;  %v1430_v25 = vrot.slane %v1425_v19, %v1429_v18 }
 0x136   :  { %1969 = vmatprep.subr.bf16.mxu1 %v1968_v29  ;;  %v1442_v32 = vrot.slane %v1425_v19, %v1441_v24 }
 0x138   :  { %1843 = vmatpush1.bf16.msra.mxu0 %v1842_v34 }
 0x139   :  { %1971 = vmatpush1.bf16.msra.mxu1 %v1970_v35  ;;  %1845 = vmatprep.subr.bf16.mxu0 %v1844_v36 }
 0x13a   :  { %1973 = vmatprep.subr.bf16.mxu1 %v1972_v40 }
 0x13c   :  { %1847 = vmatpush1.bf16.msra.mxu0 %v1846_v45 }
 0x13d   :  { %1975 = vmatpush1.bf16.msra.mxu1 %v1974_v46  ;;  %1849 = vmatprep.subr.bf16.mxu0 %v1848_v47 }
 0x13e   :  { %1977 = vmatprep.subr.bf16.mxu1 %v1976_v51 }
 0x140   :  { %1851 = vmatpush1.bf16.msra.mxu0 %v1850_v57 }
 0x141   :  { %1979 = vmatpush1.bf16.msra.mxu1 %v1978_v58  ;;  %1853 = vmatprep.subr.bf16.mxu0 %v1852_v62 }
 0x142   :  { %1981 = vmatprep.subr.bf16.mxu1 %v1980_v2 }
 0x144   :  { %1855 = vmatpush1.bf16.msra.mxu0 %v1854_v9 }
 0x145   :  { %1983 = vmatpush1.bf16.msra.mxu1 %v1982_v10  ;;  %1857 = vmatprep.subr.bf16.mxu0 %v1856_v11 }
 0x146   :  { %1985 = vmatprep.subr.bf16.mxu1 %v1984_v14 }
 0x148   :  { %1859 = vmatpush1.bf16.msra.mxu0 %v1858_v17 }
 0x149   :  { %1987 = vmatpush1.bf16.msra.mxu1 %v1986_v60 }
 0x14b   :  { %1273 = vmatmul.mubr.f32.vlgmr.msra.gmra.mrb[0].mxu0 %v3302_v22 }
 0x14c   :  { %1415 = vmatmul.mubr.f32.vlgmr.msra.gmra.mrb[0].mxu1 %v3302_v22 }
 0x21e   :  { %v1274_v26 = vpop.f32.mrb[0].mxu0 }
 0x21f   :  { %v1421_v28 = vmax.f32 %v1274_v26, 0.0  ;;  %v1416_v29 = vpop.f32.mrb[0].mxu1  ;;  %v1276_v59 = vpop.f32.mrb[1].mxu0 }
 0x220   :  { %v1423_v22 = vmax.f32 %v1416_v29, 0.0  ;;  %v1422_v30 = vmax.f32 %v1276_v59, 0.0  ;;  %v1418_v31 = vpop.f32.mrb[1].mxu1 }
 0x221   :  { %v1447_v33 = vmul.f32 %v1430_v25, %v1421_v28  ;;  %v1424_v34 = vmax.f32 %v1418_v31, 0.0 }
 0x222   :  { %v1449_v35 = vmul.f32 %v1438_v27, %v1423_v22  ;;  %v1448_v36 = vmul.f32 %v1434_v20, %v1422_v30 }
 0x223   :  { %v1452_v37 = vsel %vm1451_vm4, %v1447_v33, 0.0  ;;  %v1450_v39 = vmul.f32 %v1442_v32, %v1424_v34 }
 0x224   :  { %v1453_v38 = vsel %vm1451_vm4, %v1448_v36, 0.0  ;;  %v1455_v40 = vsel %vm1451_vm4, %v1449_v35, 0.0 }
 0x225   :  { %v1454_v4 = vadd.f32 %v1453_v38, %v1452_v37  ;;  %v1457_v42 = vsel %vm1451_vm4, %v1450_v39, 0.0 }
 0x227   :  { %v1456_v41 = vadd.f32 %v1455_v40, %v1454_v4 }
 0x229   :  { %v1458_v43 = vadd.f32 %v1457_v42, %v1456_v41 }
 0x22b   :  { %1459 = vadd.xlane.f32.xlu1 %v1458_v43 }
 0x2b8   :  { %v1460_v5 = vpop.xlane.xlu1 %1459 }
 0x2b9   :  { %v1475_v44 = vmul.f32 -1.442695, %v1460_v5 }
 0x2bb   :  { %2004 = vpow2.f32 %v1475_v44 }
 0x2c5   :  { %v2005_v45 = vpop.eup %2004 }
 0x2c6   :  { %v1464_v46 = vadd.f32 1.0, %v2005_v45 }
 0x2c8   :  { %2006 = vrcp.f32 %v1464_v46 }
 0x2d2   :  { %v2007_v47 = vpop.eup %2006 }
 0x2d3   :  { %v1467_v48 = vmax.f32 %v2007_v47, 0.1 }
 0x2d5   :  { %v1468_v49 = vmin.f32 %v1467_v48, 0.9 }
 0x2d7   :  { %1470 = vst.msk [vmem:[%s3687_s7] sm:$0x3] %vm1469_vm5, %v1468_v49 }

</bundles_post_ra>
